<compile_context>
chip_gen: v7x
topology: tpu7x:2x2x1
jax: 0.10.0
libtpu: 0.0.40
codegen_flags: <defaults>
</compile_context>

<pallas_src>
import functools

import jax
import jax.numpy as jnp
from jax.experimental import pallas as pl
from jax.experimental.pallas import tpu as pltpu

# Stand-in backbone channel widths (regnet_x_400mf trunk_output.block{2,3,4}).
C3, C4, C5 = 64, 160, 400


# ----------------------------- kernel bodies --------------------------------

def _matmul_bias_kernel(x_ref, w_ref, b_ref, o_ref, *, relu):
    acc = jnp.dot(x_ref[...], w_ref[...], preferred_element_type=jnp.float32)
    acc = acc + b_ref[...]
    if relu:
        acc = jnp.maximum(acc, 0.0)
    o_ref[...] = acc.astype(o_ref.dtype)


def _down2_kernel(xe_ref, xo_ref, w0_ref, w1_ref, b_ref, o_ref):
    # Stride-2 patchify conv + ReLU.  xe/xo deliver the even/odd input-row planes
    # (same contiguous row block in each) -> two plain 2-D MXU matmuls, summed in f32.
    acc = jnp.dot(xe_ref[0, 0, 0], w0_ref[...], preferred_element_type=jnp.float32)
    acc = acc + jnp.dot(xo_ref[0, 0, 0], w1_ref[...], preferred_element_type=jnp.float32)
    acc = jnp.maximum(acc + b_ref[...], 0.0)
    o_ref[...] = acc[None, None].astype(o_ref.dtype)


def _down2_lateral_kernel(xe_ref, xo_ref, w0_ref, w1_ref, b_ref, lw_ref, lb_ref, o_ref):
    # Fused c5 stage: stride-2 conv + ReLU immediately followed by the 1x1 l5
    # lateral conv -> c5 never leaves VMEM.
    acc = jnp.dot(xe_ref[0, 0], w0_ref[...], preferred_element_type=jnp.float32)
    acc = acc + jnp.dot(xo_ref[0, 0], w1_ref[...], preferred_element_type=jnp.float32)
    c5 = jnp.maximum(acc + b_ref[...], 0.0).astype(jnp.bfloat16)
    p5 = jnp.dot(c5, lw_ref[...], preferred_element_type=jnp.float32) + lb_ref[...]
    o_ref[...] = p5[None].astype(o_ref.dtype)


def _lateral_kernel(x_ref, w_ref, b_ref, t_ref, o_ref, *, lead):
    # Fused FPN level: paired 1x1 lateral conv + nearest-2x upsampled top add.
    # W-duplication = lane concat (paired outputs); H-duplication is done by the
    # index maps (both output H-parity planes read the same top block).
    x = x_ref[(0,) * lead]
    acc = jnp.dot(x, w_ref[...], preferred_element_type=jnp.float32) + b_ref[...]
    t = t_ref[(0,) * (lead - 1)]
    acc = acc + jnp.concatenate([t, t], axis=-1)
    o_ref[...] = acc[(None,) * lead].astype(o_ref.dtype)


# ----------------------------- kernel wrappers -------------------------------

def _pick_tm(m, row_bytes, *, cap=512, target_bytes=1 << 20):
    """Largest row block dividing m that is 8-aligned (or full extent) and fits budget."""
    divisors = [d for d in range(1, m + 1) if m % d == 0]
    valid = [d for d in divisors if d % 8 == 0 or d == m]
    good = [d for d in valid if d <= cap and d * row_bytes <= target_bytes]
    return max(good) if good else min(valid)


def matmul_bias(x, w, b, *, relu=False, out_dtype=jnp.float32):
    """(M, K) @ (K, N) + b, optional ReLU; bf16 operands, f32 accumulation."""
    m, k = x.shape
    n = w.shape[1]
    tm = _pick_tm(m, k * 2 + n * 4)
    return pl.pallas_call(
        functools.partial(_matmul_bias_kernel, relu=relu),
        out_shape=jax.ShapeDtypeStruct((m, n), out_dtype),
        grid=(m // tm,),
        in_specs=[
            pl.BlockSpec((tm, k), lambda i: (i, 0)),
            pl.BlockSpec((k, n), lambda i: (0, 0)),
            pl.BlockSpec((1, n), lambda i: (0, 0)),
        ],
        out_specs=pl.BlockSpec((tm, n), lambda i: (i, 0)),
        compiler_params=pltpu.CompilerParams(dimension_semantics=("parallel",)),
    )(x, w, b)


def down2(x, w0, w1, b, *, out_dtype=jnp.bfloat16):
    """Stride-2 conv + ReLU.  x: (B, 2, P, M, K), dim1 = input-row parity.
    Output (B, P, M, N); row m of plane (b, p) uses inputs (b, 0, p, m) and (b, 1, p, m)."""
    B, _, P, M, K = x.shape
    n = w0.shape[1]
    tm = _pick_tm(M, 2 * K * 2 + n * 2)
    return pl.pallas_call(
        _down2_kernel,
        out_shape=jax.ShapeDtypeStruct((B, P, M, n), out_dtype),
        grid=(B, P, M // tm),
        in_specs=[
            pl.BlockSpec((1, 1, 1, tm, K), lambda bb, p, i: (bb, 0, p, i, 0)),
            pl.BlockSpec((1, 1, 1, tm, K), lambda bb, p, i: (bb, 1, p, i, 0)),
            pl.BlockSpec((K, n), lambda bb, p, i: (0, 0)),
            pl.BlockSpec((K, n), lambda bb, p, i: (0, 0)),
            pl.BlockSpec((1, n), lambda bb, p, i: (0, 0)),
        ],
        out_specs=pl.BlockSpec((1, 1, tm, n), lambda bb, p, i: (bb, p, i, 0)),
        compiler_params=pltpu.CompilerParams(
            dimension_semantics=("parallel", "parallel", "parallel")),
    )(x, x, w0, w1, b)


def down2_lateral(x, w0, w1, b, lw, lb, *, out_dtype=jnp.float32):
    """Fused c5 stage: stride-2 conv + ReLU + 1x1 lateral conv.  x: (B, 2, M, K) -> (B, M, N2)."""
    B, _, M, K = x.shape
    n1 = w0.shape[1]
    n2 = lw.shape[1]
    tm = _pick_tm(M, 2 * K * 2 + n1 * 4, cap=256)
    return pl.pallas_call(
        _down2_lateral_kernel,
        out_shape=jax.ShapeDtypeStruct((B, M, n2), out_dtype),
        grid=(B, M // tm),
        in_specs=[
            pl.BlockSpec((1, 1, tm, K), lambda bb, i: (bb, 0, i, 0)),
            pl.BlockSpec((1, 1, tm, K), lambda bb, i: (bb, 1, i, 0)),
            pl.BlockSpec((K, n1), lambda bb, i: (0, 0)),
            pl.BlockSpec((K, n1), lambda bb, i: (0, 0)),
            pl.BlockSpec((1, n1), lambda bb, i: (0, 0)),
            pl.BlockSpec((n1, n2), lambda bb, i: (0, 0)),
            pl.BlockSpec((1, n2), lambda bb, i: (0, 0)),
        ],
        out_specs=pl.BlockSpec((1, tm, n2), lambda bb, i: (bb, i, 0)),
        compiler_params=pltpu.CompilerParams(
            dimension_semantics=("parallel", "parallel")),
    )(x, x, w0, w1, b, lw, lb)


def lateral_up_add(x, w, b, top, *, out_dtype=jnp.float32):
    """Fused FPN level: paired 1x1 lateral conv + nearest-2x upsampled `top` add.

    x:   (B, *par, M, K)       lateral input (par = H-parity axes, each size 2)
    top: (B, *par[1:], M, Nt)  upper level (half H and W resolution)
    out: (B, *par, M, 2*Nt)    W-paired.
    """
    xs = x.shape
    B, M, K = xs[0], xs[-2], xs[-1]
    par = xs[1:-2]
    lead = 1 + len(par)
    n = w.shape[1]
    nt = top.shape[-1]
    tm = _pick_tm(M, K * 2 + nt * 4 + n * 4)
    grid = (B,) + par + (M // tm,)
    x_map = lambda bb, *r: (bb, *r, 0)
    t_map = lambda bb, *r: (bb, *r[1:], 0)
    return pl.pallas_call(
        functools.partial(_lateral_kernel, lead=lead),
        out_shape=jax.ShapeDtypeStruct(xs[:-1] + (n,), out_dtype),
        grid=grid,
        in_specs=[
            pl.BlockSpec((1,) * lead + (tm, K), x_map),
            pl.BlockSpec((K, n), lambda *a: (0, 0)),
            pl.BlockSpec((1, n), lambda *a: (0, 0)),
            pl.BlockSpec((1,) * (lead - 1) + (tm, nt), t_map),
        ],
        out_specs=pl.BlockSpec((1,) * lead + (tm, n), x_map),
        compiler_params=pltpu.CompilerParams(
            dimension_semantics=("parallel",) * len(grid)),
    )(x, w, b, top)


# ----------------------------- layout glue (free reshapes + one transpose) ---

def _dup_cols(w):
    """kron(I2, w): (K, N) -> (2K, 2N) block-diagonal (W-paired lane weights)."""
    z = jnp.zeros_like(w)
    return jnp.concatenate(
        [jnp.concatenate([w, z], axis=1), jnp.concatenate([z, w], axis=1)], axis=0)


def _extract_patches(images, dtype):
    """(B, 3, H, W) -> (B*4*msub, 384) stride-8, W-paired 8x8 patches.

    Row order (b, h3%2, (h3//2)%2, h3//4, w3//2); features (w3%2, c, ph, pw).
    The parity-major row order makes every later stage's stride-2 inputs and
    2x-upsampled top feeds contiguous row blocks.  Image cast to `dtype` (bf16)
    BEFORE the transpose to halve its HBM traffic.
    """
    B, C, H, W = images.shape
    x = images.astype(dtype)
    x = x.reshape(B, C, H // 32, 2, 2, 8, W // 16, 2, 8)
    #             b  c  j4      dh4 dh3 ph  wp3      dw3 pw
    x = jnp.transpose(x, (0, 4, 3, 2, 6, 7, 1, 5, 8))
    return x.reshape(B * 4 * (H // 32) * (W // 16), 2 * C * 64)


# ----------------------------- parameters ------------------------------------

def _conv_init(key, fan_in, cout):
    # PyTorch Conv2d default init: U(-1/sqrt(fan_in), 1/sqrt(fan_in))
    bound = 1.0 / float(fan_in) ** 0.5
    kw, kb = jax.random.split(key)
    w = jax.random.uniform(kw, (fan_in, cout), jnp.float32, -bound, bound)
    b = jax.random.uniform(kb, (1, cout), jnp.float32, -bound, bound)
    return w, b


def init_params(out_channels, key):
    ks = jax.random.split(key, 6)
    p = {}
    # TODO(synk): pretrained regnet_x_400mf trunk weights unavailable; deterministic
    # stand-in patchify backbone with matching strides/channels is used instead.
    p['bb3_w'], p['bb3_b'] = _conv_init(ks[0], 3 * 64, C3)     # 8x8 / stride 8
    p['bb4_w'], p['bb4_b'] = _conv_init(ks[1], 4 * C3, C4)     # 2x2 / stride 2
    p['bb5_w'], p['bb5_b'] = _conv_init(ks[2], 4 * C4, C5)     # 2x2 / stride 2
    p['l3_w'], p['l3_b'] = _conv_init(ks[3], C3, out_channels)
    p['l4_w'], p['l4_b'] = _conv_init(ks[4], C4, out_channels)
    p['l5_w'], p['l5_b'] = _conv_init(ks[5], C5, out_channels)
    # NOTE: o3/o4/o5 3x3 convs exist in the PyTorch __init__ but are never applied
    # in forward(), so they are intentionally omitted.
    return p


# ----------------------------- forward ---------------------------------------

def forward(params, images):
    B, C, H, W = images.shape
    assert C == 3 and H % 32 == 0 and W % 32 == 0, "need (B, 3, H, W), H, W % 32 == 0"
    bf16 = jnp.bfloat16
    p = params
    oc = p['l3_w'].shape[1]
    H3, W3 = H // 8, W // 8
    H4, W4 = H // 16, W // 16
    H5, W5 = H // 32, W // 32
    W3p = W3 // 2
    msub = (H3 // 4) * W3p      # rows per (h3-parity, h4-parity) plane == (H4//2)*W4
    mp5 = H5 * W5               # rows per h4-parity plane of W-paired c4 == p5 rows

    # ---- stem (8x8/8 patchify conv + ReLU) as one flat matmul over W-paired patches.
    patches = _extract_patches(images, bf16)                       # (B*4*msub, 384)
    c3p = matmul_bias(patches, _dup_cols(p['bb3_w']).astype(bf16),
                      jnp.tile(p['bb3_b'], (1, 2)), relu=True, out_dtype=bf16)
    c3p = c3p.reshape(B, 2, 2, msub, 2 * C3)   # (b, dh3, dh4, (j4, wp3), (dw3, c))

    # ---- c4: stride-2 conv + ReLU (rows come out h4-parity-major for free).
    w4 = p['bb4_w'].astype(bf16)
    c4 = down2(c3p, w4[:2 * C3], w4[2 * C3:], p['bb4_b'], out_dtype=bf16)  # (B,2,msub,160)
    c4p = c4.reshape(B, 2, mp5, 2 * C4)        # W-paired view (free reshape)

    # ---- c5 + p5 fused: c5 never hits HBM; p5 comes out in plain (h5, w5) row order.
    w5 = p['bb5_w'].astype(bf16)
    p5 = down2_lateral(c4p, w5[:2 * C4], w5[2 * C4:], p['bb5_b'],
                       p['l5_w'].astype(bf16), p['l5_b'])          # (B, mp5, oc) f32

    # ---- p4 = l4(c4) + up2(p5), one fused call (H-upsample via index maps).
    p4p = lateral_up_add(c4p, _dup_cols(p['l4_w']).astype(bf16),
                         jnp.tile(p['l4_b'], (1, 2)), p5)          # (B, 2, mp5, 2*oc)

    # ---- p3 = l3(c3) + up2(p4); the top feed is a free reshape of p4p.
    p4_top = p4p.reshape(B, 2, H5, W5, 2, oc).reshape(B, 2, msub, oc)
    p3p = lateral_up_add(c3p, _dup_cols(p['l3_w']).astype(bf16),
                         jnp.tile(p['l3_b'], (1, 2)), p4_top)      # (B, 2, 2, msub, 2*oc)

    # ---- unscramble to NCHW: one XLA transpose per level (needed for NCHW anyway;
    # the parity/pair un-interleave rides along in the same single pass).
    p5_out = jnp.transpose(p5.reshape(B, H5, W5, oc), (0, 3, 1, 2))
    p4_out = jnp.transpose(p4p.reshape(B, 2, H5, W5, 2, oc),
                           (0, 5, 2, 1, 3, 4)).reshape(B, oc, H4, W4)
    p3_out = jnp.transpose(p3p.reshape(B, 2, 2, H3 // 4, W3p, 2, oc),
                           (0, 6, 3, 2, 1, 4, 5)).reshape(B, oc, H3, W3)
    return {'p3': p3_out, 'p4': p4_out, 'p5': p5_out}


# ----------------------------- pure-JAX reference ----------------------------

def reference(params, images):
    """Same math as the kernels: bf16 operands, f32 accumulation, bf16 activations."""
    bf16 = jnp.bfloat16

    def mm(x, w, b, relu):
        y = jnp.dot(x.astype(bf16), w.astype(bf16),
                    preferred_element_type=jnp.float32) + b
        return jnp.maximum(y, 0.0) if relu else y

    def s2d(x):  # space-to-depth, s=2, feature order (dh, dw, c)
        B, H, W, C = x.shape
        x = x.reshape(B, H // 2, 2, W // 2, 2, C)
        x = jnp.transpose(x, (0, 1, 3, 2, 4, 5))
        return x.reshape(B, H // 2, W // 2, 4 * C)

    def up2(t):  # nearest, scale_factor=2
        return jnp.repeat(jnp.repeat(t, 2, axis=1), 2, axis=2)

    B, _, H, W = images.shape
    x = images.astype(jnp.float32).reshape(B, 3, H // 8, 8, W // 8, 8)
    x = jnp.transpose(x, (0, 2, 4, 1, 3, 5)).reshape(B, H // 8, W // 8, 3 * 64)
    c3 = mm(x.reshape(-1, 3 * 64), params['bb3_w'], params['bb3_b'], True)
    c3 = c3.astype(bf16).reshape(B, H // 8, W // 8, C3)
    c4 = mm(s2d(c3).reshape(-1, 4 * C3), params['bb4_w'], params['bb4_b'], True)
    c4 = c4.astype(bf16).reshape(B, H // 16, W // 16, C4)
    c5 = mm(s2d(c4).reshape(-1, 4 * C4), params['bb5_w'], params['bb5_b'], True)
    c5 = c5.astype(bf16).reshape(B, H // 32, W // 32, C5)
    p5 = mm(c5.reshape(-1, C5), params['l5_w'], params['l5_b'], False)
    p5 = p5.reshape(B, H // 32, W // 32, -1)
    p4 = mm(c4.reshape(-1, C4), params['l4_w'], params['l4_b'], False)
    p4 = p4.reshape(B, H // 16, W // 16, -1) + up2(p5)
    p3 = mm(c3.reshape(-1, C3), params['l3_w'], params['l3_b'], False)
    p3 = p3.reshape(B, H // 8, W // 8, -1) + up2(p4)
    nchw = lambda t: jnp.transpose(t, (0, 3, 1, 2))
    return {'p3': nchw(p3), 'p4': nchw(p4), 'p5': nchw(p5)}


# ----------------------------- main ------------------------------------------

if __name__ == "__main__":
    key = jax.random.PRNGKey(0)
    pkey, xkey = jax.random.split(key)

    out_channels = 64
    params = init_params(out_channels, pkey)
    # NCHW input like the PyTorch module; 128x128 keeps the test small while still
    # exercising the multi-row (8-aligned) blocking path of every kernel.
    images = jax.random.normal(xkey, (2, 3, 128, 128), jnp.float32)

    fpn = jax.jit(forward)(params, images)
    jax.block_until_ready(fpn)

    assert fpn['p5'].shape == (2, out_channels, 4, 4)
    assert fpn['p4'].shape == (2, out_channels, 8, 8)
    assert fpn['p3'].shape == (2, out_channels, 16, 16)

    ref = reference(params, images)
    # Tolerance reflects bf16 activation storage (a bf16-ulp rounding flip on an
    # intermediate moves the output by ~1e-3); plumbing bugs would be O(0.1+).
    for level in ('p3', 'p4', 'p5'):
        err = float(jnp.max(jnp.abs(fpn[level] - ref[level])))
        assert err < 5e-3, (level, err)

    print("KERNEL_OK")
</pallas_src>

<mosaic_0001>
module attributes {stable_mosaic.version = 11 : i64} {
  func.func @_matmul_bias_kernel(%arg0: i32, %arg1: memref<256x384xbf16, #tpu.memory_space<vmem>>, %arg2: memref<384x128xbf16, #tpu.memory_space<vmem>>, %arg3: memref<1x128xf32, #tpu.memory_space<vmem>>, %arg4: memref<256x128xbf16, #tpu.memory_space<vmem>>) attributes {dimension_semantics = [#tpu.dimension_semantics<parallel>], iteration_bounds = array<i64: 1>, scalar_prefetch = 0 : i64, scratch_operands = 0 : i64, tpu.core_type = #tpu.core_type<tc>, window_params = [{transform_indices = @transform_0, window_bounds = array<i64: 256, 384>}, {pipeline_mode = #tpu.pipeline_mode<synchronous>, transform_indices = @transform_1, window_bounds = array<i64: 384, 128>}, {pipeline_mode = #tpu.pipeline_mode<synchronous>, transform_indices = @transform_2, window_bounds = array<i64: 1, 128>}, {transform_indices = @transform_3, window_bounds = array<i64: 256, 128>}]} {
    %c0 = arith.constant 0 : index
    %c0_0 = arith.constant 0 : index
    %0 = vector.load %arg1[%c0, %c0_0] : memref<256x384xbf16, #tpu.memory_space<vmem>>, vector<256x384xbf16>
    %c0_1 = arith.constant 0 : index
    %c0_2 = arith.constant 0 : index
    %1 = vector.load %arg2[%c0_1, %c0_2] : memref<384x128xbf16, #tpu.memory_space<vmem>>, vector<384x128xbf16>
    %cst = arith.constant dense<0.000000e+00> : vector<256x128xf32>
    %2 = tpu.matmul %0, %1, %cst {dimension_numbers = #tpu.dot_dimension_numbers<[1], [0], [0], [1], [0, 0, 1, 1], [], []>} : vector<256x384xbf16>, vector<384x128xbf16>, vector<256x128xf32> -> vector<256x128xf32>
    %c0_3 = arith.constant 0 : index
    %c0_4 = arith.constant 0 : index
    %3 = vector.load %arg3[%c0_3, %c0_4] : memref<1x128xf32, #tpu.memory_space<vmem>>, vector<1x128xf32>
    %4 = vector.broadcast %3 : vector<1x128xf32> to vector<256x128xf32>
    %5 = arith.addf %2, %4 : vector<256x128xf32>
    %cst_5 = arith.constant 0.000000e+00 : f32
    %6 = vector.broadcast %cst_5 : f32 to vector<256x128xf32>
    %7 = arith.maximumf %5, %6 : vector<256x128xf32>
    %8 = arith.truncf %7 : vector<256x128xf32> to vector<256x128xbf16>
    %c0_6 = arith.constant 0 : index
    %c0_7 = arith.constant 0 : index
    %9 = vector.load %arg4[%c0_6, %c0_7] : memref<256x128xbf16, #tpu.memory_space<vmem>>, vector<256x128xbf16>
    tpu.vector_store %arg4[%c0_6, %c0_7], %8 {strides = array<i32>} : memref<256x128xbf16, #tpu.memory_space<vmem>>, vector<256x128xbf16>,
    return
  }
  func.func @transform_0(%arg0: i32) -> (i32, i32) {
    %c0_i32 = arith.constant 0 : i32
    %c0_i32_0 = arith.constant 0 : i32
    return %arg0, %c0_i32 : i32, i32
  }
  func.func @transform_1(%arg0: i32) -> (i32, i32) {
    %c0_i32 = arith.constant 0 : i32
    %c0_i32_0 = arith.constant 0 : i32
    %c0_i32_1 = arith.constant 0 : i32
    return %c0_i32, %c0_i32_0 : i32, i32
  }
  func.func @transform_2(%arg0: i32) -> (i32, i32) {
    %c0_i32 = arith.constant 0 : i32
    %c0_i32_0 = arith.constant 0 : i32
    %c0_i32_1 = arith.constant 0 : i32
    return %c0_i32, %c0_i32_0 : i32, i32
  }
  func.func @transform_3(%arg0: i32) -> (i32, i32) {
    %c0_i32 = arith.constant 0 : i32
    %c0_i32_0 = arith.constant 0 : i32
    return %arg0, %c0_i32 : i32, i32
  }
}

module attributes {stable_mosaic.version = 11 : i64} {
  func.func @_down2_kernel(%arg0: i32, %arg1: i32, %arg2: i32, %arg3: memref<1x1x1x32x128xbf16, #tpu.memory_space<vmem>>, %arg4: memref<1x1x1x32x128xbf16, #tpu.memory_space<vmem>>, %arg5: memref<128x160xbf16, #tpu.memory_space<vmem>>, %arg6: memref<128x160xbf16, #tpu.memory_space<vmem>>, %arg7: memref<1x160xf32, #tpu.memory_space<vmem>>, %arg8: memref<1x1x32x160xbf16, #tpu.memory_space<vmem>>) attributes {dimension_semantics = [#tpu.dimension_semantics<parallel>, #tpu.dimension_semantics<parallel>, #tpu.dimension_semantics<parallel>], iteration_bounds = array<i64: 2, 2, 1>, scalar_prefetch = 0 : i64, scratch_operands = 0 : i64, tpu.core_type = #tpu.core_type<tc>, window_params = [{transform_indices = @transform_0, window_bounds = array<i64: 1, 1, 1, 32, 128>}, {transform_indices = @transform_1, window_bounds = array<i64: 1, 1, 1, 32, 128>}, {pipeline_mode = #tpu.pipeline_mode<synchronous>, transform_indices = @transform_2, window_bounds = array<i64: 128, 160>}, {pipeline_mode = #tpu.pipeline_mode<synchronous>, transform_indices = @transform_3, window_bounds = array<i64: 128, 160>}, {pipeline_mode = #tpu.pipeline_mode<synchronous>, transform_indices = @transform_4, window_bounds = array<i64: 1, 160>}, {transform_indices = @transform_5, window_bounds = array<i64: 1, 1, 32, 160>}]} {
    %c0 = arith.constant 0 : index
    %c0_0 = arith.constant 0 : index
    %c0_1 = arith.constant 0 : index
    %c0_2 = arith.constant 0 : index
    %c0_3 = arith.constant 0 : index
    %0 = vector.load %arg3[%c0, %c0_0, %c0_1, %c0_2, %c0_3] : memref<1x1x1x32x128xbf16, #tpu.memory_space<vmem>>, vector<1x1x1x32x128xbf16>
    %1 = vector.shape_cast %0 : vector<1x1x1x32x128xbf16> to vector<32x128xbf16>
    %c0_4 = arith.constant 0 : index
    %c0_5 = arith.constant 0 : index
    %2 = vector.load %arg5[%c0_4, %c0_5] : memref<128x160xbf16, #tpu.memory_space<vmem>>, vector<128x160xbf16>
    %cst = arith.constant dense<0.000000e+00> : vector<32x160xf32>
    %3 = tpu.matmul %1, %2, %cst {dimension_numbers = #tpu.dot_dimension_numbers<[1], [0], [0], [1], [0, 0, 1, 1], [], []>} : vector<32x128xbf16>, vector<128x160xbf16>, vector<32x160xf32> -> vector<32x160xf32>
    %c0_6 = arith.constant 0 : index
    %c0_7 = arith.constant 0 : index
    %c0_8 = arith.constant 0 : index
    %c0_9 = arith.constant 0 : index
    %c0_10 = arith.constant 0 : index
    %4 = vector.load %arg4[%c0_6, %c0_7, %c0_8, %c0_9, %c0_10] : memref<1x1x1x32x128xbf16, #tpu.memory_space<vmem>>, vector<1x1x1x32x128xbf16>
    %5 = vector.shape_cast %4 : vector<1x1x1x32x128xbf16> to vector<32x128xbf16>
    %c0_11 = arith.constant 0 : index
    %c0_12 = arith.constant 0 : index
    %6 = vector.load %arg6[%c0_11, %c0_12] : memref<128x160xbf16, #tpu.memory_space<vmem>>, vector<128x160xbf16>
    %cst_13 = arith.constant dense<0.000000e+00> : vector<32x160xf32>
    %7 = tpu.matmul %5, %6, %cst_13 {dimension_numbers = #tpu.dot_dimension_numbers<[1], [0], [0], [1], [0, 0, 1, 1], [], []>} : vector<32x128xbf16>, vector<128x160xbf16>, vector<32x160xf32> -> vector<32x160xf32>
    %8 = arith.addf %3, %7 : vector<32x160xf32>
    %c0_14 = arith.constant 0 : index
    %c0_15 = arith.constant 0 : index
    %9 = vector.load %arg7[%c0_14, %c0_15] : memref<1x160xf32, #tpu.memory_space<vmem>>, vector<1x160xf32>
    %10 = vector.broadcast %9 : vector<1x160xf32> to vector<32x160xf32>
    %11 = arith.addf %8, %10 : vector<32x160xf32>
    %cst_16 = arith.constant 0.000000e+00 : f32
    %12 = vector.broadcast %cst_16 : f32 to vector<32x160xf32>
    %13 = arith.maximumf %11, %12 : vector<32x160xf32>
    %14 = vector.shape_cast %13 : vector<32x160xf32> to vector<1x1x32x160xf32>
    %15 = arith.truncf %14 : vector<1x1x32x160xf32> to vector<1x1x32x160xbf16>
    %c0_17 = arith.constant 0 : index
    %c0_18 = arith.constant 0 : index
    %c0_19 = arith.constant 0 : index
    %c0_20 = arith.constant 0 : index
    %16 = vector.load %arg8[%c0_17, %c0_18, %c0_19, %c0_20] : memref<1x1x32x160xbf16, #tpu.memory_space<vmem>>, vector<1x1x32x160xbf16>
    tpu.vector_store %arg8[%c0_17, %c0_18, %c0_19, %c0_20], %15 {strides = array<i32>} : memref<1x1x32x160xbf16, #tpu.memory_space<vmem>>, vector<1x1x32x160xbf16>,
    return
  }
  func.func @transform_0(%arg0: i32, %arg1: i32, %arg2: i32) -> (i32, i32, i32, i32, i32) {
    %c0_i32 = arith.constant 0 : i32
    %c0_i32_0 = arith.constant 0 : i32
    %c0_i32_1 = arith.constant 0 : i32
    return %arg0, %c0_i32, %arg1, %arg2, %c0_i32_0 : i32, i32, i32, i32, i32
  }
  func.func @transform_1(%arg0: i32, %arg1: i32, %arg2: i32) -> (i32, i32, i32, i32, i32) {
    %c1_i32 = arith.constant 1 : i32
    %c0_i32 = arith.constant 0 : i32
    %c0_i32_0 = arith.constant 0 : i32
    return %arg0, %c1_i32, %arg1, %arg2, %c0_i32 : i32, i32, i32, i32, i32
  }
  func.func @transform_2(%arg0: i32, %arg1: i32, %arg2: i32) -> (i32, i32) {
    %c0_i32 = arith.constant 0 : i32
    %c0_i32_0 = arith.constant 0 : i32
    %c0_i32_1 = arith.constant 0 : i32
    return %c0_i32, %c0_i32_0 : i32, i32
  }
  func.func @transform_3(%arg0: i32, %arg1: i32, %arg2: i32) -> (i32, i32) {
    %c0_i32 = arith.constant 0 : i32
    %c0_i32_0 = arith.constant 0 : i32
    %c0_i32_1 = arith.constant 0 : i32
    return %c0_i32, %c0_i32_0 : i32, i32
  }
  func.func @transform_4(%arg0: i32, %arg1: i32, %arg2: i32) -> (i32, i32) {
    %c0_i32 = arith.constant 0 : i32
    %c0_i32_0 = arith.constant 0 : i32
    %c0_i32_1 = arith.constant 0 : i32
    return %c0_i32, %c0_i32_0 : i32, i32
  }
  func.func @transform_5(%arg0: i32, %arg1: i32, %arg2: i32) -> (i32, i32, i32, i32) {
    %c0_i32 = arith.constant 0 : i32
    %c0_i32_0 = arith.constant 0 : i32
    return %arg0, %arg1, %arg2, %c0_i32 : i32, i32, i32, i32
  }
}

module attributes {stable_mosaic.version = 11 : i64} {
  func.func @_down2_lateral_kernel(%arg0: i32, %arg1: i32, %arg2: memref<1x1x16x320xbf16, #tpu.memory_space<vmem>>, %arg3: memref<1x1x16x320xbf16, #tpu.memory_space<vmem>>, %arg4: memref<320x400xbf16, #tpu.memory_space<vmem>>, %arg5: memref<320x400xbf16, #tpu.memory_space<vmem>>, %arg6: memref<1x400xf32, #tpu.memory_space<vmem>>, %arg7: memref<400x64xbf16, #tpu.memory_space<vmem>>, %arg8: memref<1x64xf32, #tpu.memory_space<vmem>>, %arg9: memref<1x16x64xf32, #tpu.memory_space<vmem>>) attributes {dimension_semantics = [#tpu.dimension_semantics<parallel>, #tpu.dimension_semantics<parallel>], iteration_bounds = array<i64: 2, 1>, scalar_prefetch = 0 : i64, scratch_operands = 0 : i64, tpu.core_type = #tpu.core_type<tc>, window_params = [{transform_indices = @transform_0, window_bounds = array<i64: 1, 1, 16, 320>}, {transform_indices = @transform_1, window_bounds = array<i64: 1, 1, 16, 320>}, {pipeline_mode = #tpu.pipeline_mode<synchronous>, transform_indices = @transform_2, window_bounds = array<i64: 320, 400>}, {pipeline_mode = #tpu.pipeline_mode<synchronous>, transform_indices = @transform_3, window_bounds = array<i64: 320, 400>}, {pipeline_mode = #tpu.pipeline_mode<synchronous>, transform_indices = @transform_4, window_bounds = array<i64: 1, 400>}, {pipeline_mode = #tpu.pipeline_mode<synchronous>, transform_indices = @transform_5, window_bounds = array<i64: 400, 64>}, {pipeline_mode = #tpu.pipeline_mode<synchronous>, transform_indices = @transform_6, window_bounds = array<i64: 1, 64>}, {transform_indices = @transform_7, window_bounds = array<i64: 1, 16, 64>}]} {
    %c0 = arith.constant 0 : index
    %c0_0 = arith.constant 0 : index
    %c0_1 = arith.constant 0 : index
    %c0_2 = arith.constant 0 : index
    %0 = vector.load %arg2[%c0, %c0_0, %c0_1, %c0_2] : memref<1x1x16x320xbf16, #tpu.memory_space<vmem>>, vector<1x1x16x320xbf16>
    %1 = vector.shape_cast %0 : vector<1x1x16x320xbf16> to vector<16x320xbf16>
    %c0_3 = arith.constant 0 : index
    %c0_4 = arith.constant 0 : index
    %2 = vector.load %arg4[%c0_3, %c0_4] : memref<320x400xbf16, #tpu.memory_space<vmem>>, vector<320x400xbf16>
    %cst = arith.constant dense<0.000000e+00> : vector<16x400xf32>
    %3 = tpu.matmul %1, %2, %cst {dimension_numbers = #tpu.dot_dimension_numbers<[1], [0], [0], [1], [0, 0, 1, 1], [], []>} : vector<16x320xbf16>, vector<320x400xbf16>, vector<16x400xf32> -> vector<16x400xf32>
    %c0_5 = arith.constant 0 : index
    %c0_6 = arith.constant 0 : index
    %c0_7 = arith.constant 0 : index
    %c0_8 = arith.constant 0 : index
    %4 = vector.load %arg3[%c0_5, %c0_6, %c0_7, %c0_8] : memref<1x1x16x320xbf16, #tpu.memory_space<vmem>>, vector<1x1x16x320xbf16>
    %5 = vector.shape_cast %4 : vector<1x1x16x320xbf16> to vector<16x320xbf16>
    %c0_9 = arith.constant 0 : index
    %c0_10 = arith.constant 0 : index
    %6 = vector.load %arg5[%c0_9, %c0_10] : memref<320x400xbf16, #tpu.memory_space<vmem>>, vector<320x400xbf16>
    %cst_11 = arith.constant dense<0.000000e+00> : vector<16x400xf32>
    %7 = tpu.matmul %5, %6, %cst_11 {dimension_numbers = #tpu.dot_dimension_numbers<[1], [0], [0], [1], [0, 0, 1, 1], [], []>} : vector<16x320xbf16>, vector<320x400xbf16>, vector<16x400xf32> -> vector<16x400xf32>
    %8 = arith.addf %3, %7 : vector<16x400xf32>
    %c0_12 = arith.constant 0 : index
    %c0_13 = arith.constant 0 : index
    %9 = vector.load %arg6[%c0_12, %c0_13] : memref<1x400xf32, #tpu.memory_space<vmem>>, vector<1x400xf32>
    %10 = vector.broadcast %9 : vector<1x400xf32> to vector<16x400xf32>
    %11 = arith.addf %8, %10 : vector<16x400xf32>
    %cst_14 = arith.constant 0.000000e+00 : f32
    %12 = vector.broadcast %cst_14 : f32 to vector<16x400xf32>
    %13 = arith.maximumf %11, %12 : vector<16x400xf32>
    %14 = arith.truncf %13 : vector<16x400xf32> to vector<16x400xbf16>
    %c0_15 = arith.constant 0 : index
    %c0_16 = arith.constant 0 : index
    %15 = vector.load %arg7[%c0_15, %c0_16] : memref<400x64xbf16, #tpu.memory_space<vmem>>, vector<400x64xbf16>
    %cst_17 = arith.constant dense<0.000000e+00> : vector<16x64xf32>
    %16 = tpu.matmul %14, %15, %cst_17 {dimension_numbers = #tpu.dot_dimension_numbers<[1], [0], [0], [1], [0, 0, 1, 1], [], []>} : vector<16x400xbf16>, vector<400x64xbf16>, vector<16x64xf32> -> vector<16x64xf32>
    %c0_18 = arith.constant 0 : index
    %c0_19 = arith.constant 0 : index
    %17 = vector.load %arg8[%c0_18, %c0_19] : memref<1x64xf32, #tpu.memory_space<vmem>>, vector<1x64xf32>
    %18 = vector.broadcast %17 : vector<1x64xf32> to vector<16x64xf32>
    %19 = arith.addf %16, %18 : vector<16x64xf32>
    %20 = vector.shape_cast %19 : vector<16x64xf32> to vector<1x16x64xf32>
    %c0_20 = arith.constant 0 : index
    %c0_21 = arith.constant 0 : index
    %c0_22 = arith.constant 0 : index
    %21 = vector.load %arg9[%c0_20, %c0_21, %c0_22] : memref<1x16x64xf32, #tpu.memory_space<vmem>>, vector<1x16x64xf32>
    tpu.vector_store %arg9[%c0_20, %c0_21, %c0_22], %20 {strides = array<i32>} : memref<1x16x64xf32, #tpu.memory_space<vmem>>, vector<1x16x64xf32>,
    return
  }
  func.func @transform_0(%arg0: i32, %arg1: i32) -> (i32, i32, i32, i32) {
    %c0_i32 = arith.constant 0 : i32
    %c0_i32_0 = arith.constant 0 : i32
    %c0_i32_1 = arith.constant 0 : i32
    return %arg0, %c0_i32, %arg1, %c0_i32_0 : i32, i32, i32, i32
  }
  func.func @transform_1(%arg0: i32, %arg1: i32) -> (i32, i32, i32, i32) {
    %c1_i32 = arith.constant 1 : i32
    %c0_i32 = arith.constant 0 : i32
    %c0_i32_0 = arith.constant 0 : i32
    return %arg0, %c1_i32, %arg1, %c0_i32 : i32, i32, i32, i32
  }
  func.func @transform_2(%arg0: i32, %arg1: i32) -> (i32, i32) {
    %c0_i32 = arith.constant 0 : i32
    %c0_i32_0 = arith.constant 0 : i32
    %c0_i32_1 = arith.constant 0 : i32
    return %c0_i32, %c0_i32_0 : i32, i32
  }
  func.func @transform_3(%arg0: i32, %arg1: i32) -> (i32, i32) {
    %c0_i32 = arith.constant 0 : i32
    %c0_i32_0 = arith.constant 0 : i32
    %c0_i32_1 = arith.constant 0 : i32
    return %c0_i32, %c0_i32_0 : i32, i32
  }
  func.func @transform_4(%arg0: i32, %arg1: i32) -> (i32, i32) {
    %c0_i32 = arith.constant 0 : i32
    %c0_i32_0 = arith.constant 0 : i32
    %c0_i32_1 = arith.constant 0 : i32
    return %c0_i32, %c0_i32_0 : i32, i32
  }
  func.func @transform_5(%arg0: i32, %arg1: i32) -> (i32, i32) {
    %c0_i32 = arith.constant 0 : i32
    %c0_i32_0 = arith.constant 0 : i32
    %c0_i32_1 = arith.constant 0 : i32
    return %c0_i32, %c0_i32_0 : i32, i32
  }
  func.func @transform_6(%arg0: i32, %arg1: i32) -> (i32, i32) {
    %c0_i32 = arith.constant 0 : i32
    %c0_i32_0 = arith.constant 0 : i32
    %c0_i32_1 = arith.constant 0 : i32
    return %c0_i32, %c0_i32_0 : i32, i32
  }
  func.func @transform_7(%arg0: i32, %arg1: i32) -> (i32, i32, i32) {
    %c0_i32 = arith.constant 0 : i32
    %c0_i32_0 = arith.constant 0 : i32
    return %arg0, %arg1, %c0_i32 : i32, i32, i32
  }
}

module attributes {stable_mosaic.version = 11 : i64} {
  func.func @_lateral_kernel(%arg0: i32, %arg1: i32, %arg2: i32, %arg3: memref<1x1x16x320xbf16, #tpu.memory_space<vmem>>, %arg4: memref<320x128xbf16, #tpu.memory_space<vmem>>, %arg5: memref<1x128xf32, #tpu.memory_space<vmem>>, %arg6: memref<1x16x64xf32, #tpu.memory_space<vmem>>, %arg7: memref<1x1x16x128xf32, #tpu.memory_space<vmem>>) attributes {dimension_semantics = [#tpu.dimension_semantics<parallel>, #tpu.dimension_semantics<parallel>, #tpu.dimension_semantics<parallel>], iteration_bounds = array<i64: 2, 2, 1>, scalar_prefetch = 0 : i64, scratch_operands = 0 : i64, tpu.core_type = #tpu.core_type<tc>, window_params = [{transform_indices = @transform_0, window_bounds = array<i64: 1, 1, 16, 320>}, {pipeline_mode = #tpu.pipeline_mode<synchronous>, transform_indices = @transform_1, window_bounds = array<i64: 320, 128>}, {pipeline_mode = #tpu.pipeline_mode<synchronous>, transform_indices = @transform_2, window_bounds = array<i64: 1, 128>}, {transform_indices = @transform_3, window_bounds = array<i64: 1, 16, 64>}, {transform_indices = @transform_4, window_bounds = array<i64: 1, 1, 16, 128>}]} {
    %c0 = arith.constant 0 : index
    %c0_0 = arith.constant 0 : index
    %c0_1 = arith.constant 0 : index
    %c0_2 = arith.constant 0 : index
    %0 = vector.load %arg3[%c0, %c0_0, %c0_1, %c0_2] : memref<1x1x16x320xbf16, #tpu.memory_space<vmem>>, vector<1x1x16x320xbf16>
    %1 = vector.shape_cast %0 : vector<1x1x16x320xbf16> to vector<16x320xbf16>
    %c0_3 = arith.constant 0 : index
    %c0_4 = arith.constant 0 : index
    %2 = vector.load %arg4[%c0_3, %c0_4] : memref<320x128xbf16, #tpu.memory_space<vmem>>, vector<320x128xbf16>
    %cst = arith.constant dense<0.000000e+00> : vector<16x128xf32>
    %3 = tpu.matmul %1, %2, %cst {dimension_numbers = #tpu.dot_dimension_numbers<[1], [0], [0], [1], [0, 0, 1, 1], [], []>} : vector<16x320xbf16>, vector<320x128xbf16>, vector<16x128xf32> -> vector<16x128xf32>
    %c0_5 = arith.constant 0 : index
    %c0_6 = arith.constant 0 : index
    %4 = vector.load %arg5[%c0_5, %c0_6] : memref<1x128xf32, #tpu.memory_space<vmem>>, vector<1x128xf32>
    %5 = vector.broadcast %4 : vector<1x128xf32> to vector<16x128xf32>
    %6 = arith.addf %3, %5 : vector<16x128xf32>
    %c0_7 = arith.constant 0 : index
    %c0_8 = arith.constant 0 : index
    %c0_9 = arith.constant 0 : index
    %7 = vector.load %arg6[%c0_7, %c0_8, %c0_9] : memref<1x16x64xf32, #tpu.memory_space<vmem>>, vector<1x16x64xf32>
    %8 = vector.shape_cast %7 : vector<1x16x64xf32> to vector<16x64xf32>
    %9 = tpu.concatenate %8, %8 in 1 : vector<16x64xf32>, vector<16x64xf32> -> vector<16x128xf32>
    %10 = arith.addf %6, %9 : vector<16x128xf32>
    %11 = vector.shape_cast %10 : vector<16x128xf32> to vector<1x1x16x128xf32>
    %c0_10 = arith.constant 0 : index
    %c0_11 = arith.constant 0 : index
    %c0_12 = arith.constant 0 : index
    %c0_13 = arith.constant 0 : index
    %12 = vector.load %arg7[%c0_10, %c0_11, %c0_12, %c0_13] : memref<1x1x16x128xf32, #tpu.memory_space<vmem>>, vector<1x1x16x128xf32>
    tpu.vector_store %arg7[%c0_10, %c0_11, %c0_12, %c0_13], %11 {strides = array<i32>} : memref<1x1x16x128xf32, #tpu.memory_space<vmem>>, vector<1x1x16x128xf32>,
    return
  }
  func.func @transform_0(%arg0: i32, %arg1: i32, %arg2: i32) -> (i32, i32, i32, i32) {
    %c0_i32 = arith.constant 0 : i32
    %c0_i32_0 = arith.constant 0 : i32
    return %arg0, %arg1, %arg2, %c0_i32 : i32, i32, i32, i32
  }
  func.func @transform_1(%arg0: i32, %arg1: i32, %arg2: i32) -> (i32, i32) {
    %c0_i32 = arith.constant 0 : i32
    %c0_i32_0 = arith.constant 0 : i32
    %c0_i32_1 = arith.constant 0 : i32
    return %c0_i32, %c0_i32_0 : i32, i32
  }
  func.func @transform_2(%arg0: i32, %arg1: i32, %arg2: i32) -> (i32, i32) {
    %c0_i32 = arith.constant 0 : i32
    %c0_i32_0 = arith.constant 0 : i32
    %c0_i32_1 = arith.constant 0 : i32
    return %c0_i32, %c0_i32_0 : i32, i32
  }
  func.func @transform_3(%arg0: i32, %arg1: i32, %arg2: i32) -> (i32, i32, i32) {
    %c0_i32 = arith.constant 0 : i32
    %c0_i32_0 = arith.constant 0 : i32
    return %arg0, %arg2, %c0_i32 : i32, i32, i32
  }
  func.func @transform_4(%arg0: i32, %arg1: i32, %arg2: i32) -> (i32, i32, i32, i32) {
    %c0_i32 = arith.constant 0 : i32
    %c0_i32_0 = arith.constant 0 : i32
    return %arg0, %arg1, %arg2, %c0_i32 : i32, i32, i32, i32
  }
}

module attributes {stable_mosaic.version = 11 : i64} {
  func.func @_lateral_kernel(%arg0: i32, %arg1: i32, %arg2: i32, %arg3: i32, %arg4: memref<1x1x1x32x128xbf16, #tpu.memory_space<vmem>>, %arg5: memref<128x128xbf16, #tpu.memory_space<vmem>>, %arg6: memref<1x128xf32, #tpu.memory_space<vmem>>, %arg7: memref<1x1x32x64xf32, #tpu.memory_space<vmem>>, %arg8: memref<1x1x1x32x128xf32, #tpu.memory_space<vmem>>) attributes {dimension_semantics = [#tpu.dimension_semantics<parallel>, #tpu.dimension_semantics<parallel>, #tpu.dimension_semantics<parallel>, #tpu.dimension_semantics<parallel>], iteration_bounds = array<i64: 2, 2, 2, 1>, scalar_prefetch = 0 : i64, scratch_operands = 0 : i64, tpu.core_type = #tpu.core_type<tc>, window_params = [{transform_indices = @transform_0, window_bounds = array<i64: 1, 1, 1, 32, 128>}, {pipeline_mode = #tpu.pipeline_mode<synchronous>, transform_indices = @transform_1, window_bounds = array<i64: 128, 128>}, {pipeline_mode = #tpu.pipeline_mode<synchronous>, transform_indices = @transform_2, window_bounds = array<i64: 1, 128>}, {transform_indices = @transform_3, window_bounds = array<i64: 1, 1, 32, 64>}, {transform_indices = @transform_4, window_bounds = array<i64: 1, 1, 1, 32, 128>}]} {
    %c0 = arith.constant 0 : index
    %c0_0 = arith.constant 0 : index
    %c0_1 = arith.constant 0 : index
    %c0_2 = arith.constant 0 : index
    %c0_3 = arith.constant 0 : index
    %0 = vector.load %arg4[%c0, %c0_0, %c0_1, %c0_2, %c0_3] : memref<1x1x1x32x128xbf16, #tpu.memory_space<vmem>>, vector<1x1x1x32x128xbf16>
    %1 = vector.shape_cast %0 : vector<1x1x1x32x128xbf16> to vector<32x128xbf16>
    %c0_4 = arith.constant 0 : index
    %c0_5 = arith.constant 0 : index
    %2 = vector.load %arg5[%c0_4, %c0_5] : memref<128x128xbf16, #tpu.memory_space<vmem>>, vector<128x128xbf16>
    %cst = arith.constant dense<0.000000e+00> : vector<32x128xf32>
    %3 = tpu.matmul %1, %2, %cst {dimension_numbers = #tpu.dot_dimension_numbers<[1], [0], [0], [1], [0, 0, 1, 1], [], []>} : vector<32x128xbf16>, vector<128x128xbf16>, vector<32x128xf32> -> vector<32x128xf32>
    %c0_6 = arith.constant 0 : index
    %c0_7 = arith.constant 0 : index
    %4 = vector.load %arg6[%c0_6, %c0_7] : memref<1x128xf32, #tpu.memory_space<vmem>>, vector<1x128xf32>
    %5 = vector.broadcast %4 : vector<1x128xf32> to vector<32x128xf32>
    %6 = arith.addf %3, %5 : vector<32x128xf32>
    %c0_8 = arith.constant 0 : index
    %c0_9 = arith.constant 0 : index
    %c0_10 = arith.constant 0 : index
    %c0_11 = arith.constant 0 : index
    %7 = vector.load %arg7[%c0_8, %c0_9, %c0_10, %c0_11] : memref<1x1x32x64xf32, #tpu.memory_space<vmem>>, vector<1x1x32x64xf32>
    %8 = vector.shape_cast %7 : vector<1x1x32x64xf32> to vector<32x64xf32>
    %9 = tpu.concatenate %8, %8 in 1 : vector<32x64xf32>, vector<32x64xf32> -> vector<32x128xf32>
    %10 = arith.addf %6, %9 : vector<32x128xf32>
    %11 = vector.shape_cast %10 : vector<32x128xf32> to vector<1x1x1x32x128xf32>
    %c0_12 = arith.constant 0 : index
    %c0_13 = arith.constant 0 : index
    %c0_14 = arith.constant 0 : index
    %c0_15 = arith.constant 0 : index
    %c0_16 = arith.constant 0 : index
    %12 = vector.load %arg8[%c0_12, %c0_13, %c0_14, %c0_15, %c0_16] : memref<1x1x1x32x128xf32, #tpu.memory_space<vmem>>, vector<1x1x1x32x128xf32>
    tpu.vector_store %arg8[%c0_12, %c0_13, %c0_14, %c0_15, %c0_16], %11 {strides = array<i32>} : memref<1x1x1x32x128xf32, #tpu.memory_space<vmem>>, vector<1x1x1x32x128xf32>,
    return
  }
  func.func @transform_0(%arg0: i32, %arg1: i32, %arg2: i32, %arg3: i32) -> (i32, i32, i32, i32, i32) {
    %c0_i32 = arith.constant 0 : i32
    %c0_i32_0 = arith.constant 0 : i32
    return %arg0, %arg1, %arg2, %arg3, %c0_i32 : i32, i32, i32, i32, i32
  }
  func.func @transform_1(%arg0: i32, %arg1: i32, %arg2: i32, %arg3: i32) -> (i32, i32) {
    %c0_i32 = arith.constant 0 : i32
    %c0_i32_0 = arith.constant 0 : i32
    %c0_i32_1 = arith.constant 0 : i32
    return %c0_i32, %c0_i32_0 : i32, i32
  }
  func.func @transform_2(%arg0: i32, %arg1: i32, %arg2: i32, %arg3: i32) -> (i32, i32) {
    %c0_i32 = arith.constant 0 : i32
    %c0_i32_0 = arith.constant 0 : i32
    %c0_i32_1 = arith.constant 0 : i32
    return %c0_i32, %c0_i32_0 : i32, i32
  }
  func.func @transform_3(%arg0: i32, %arg1: i32, %arg2: i32, %arg3: i32) -> (i32, i32, i32, i32) {
    %c0_i32 = arith.constant 0 : i32
    %c0_i32_0 = arith.constant 0 : i32
    return %arg0, %arg2, %arg3, %c0_i32 : i32, i32, i32, i32
  }
  func.func @transform_4(%arg0: i32, %arg1: i32, %arg2: i32, %arg3: i32) -> (i32, i32, i32, i32, i32) {
    %c0_i32 = arith.constant 0 : i32
    %c0_i32_0 = arith.constant 0 : i32
    return %arg0, %arg1, %arg2, %arg3, %c0_i32 : i32, i32, i32, i32, i32
  }
}

</mosaic_0001>

<bundles_post_ra>
// kernel: forward.5
= control target key start
LH: loop header
LB: loop body
LE: loop exit
PB: predicated region body
PF: predicated region fallthrough
CT: control target
= control target key end

     0   :  { %s1923_s1 = inlined_call_operand.vmem [shape: bf16[384,128], index: 1, kind: input, shape index: {}]   ;;  %s1924_s0 = inlined_call_operand.vmem [shape: bf16[256,384], index: 0, kind: input, shape index: {}]   ;;  %s1925_s2 = inlined_call_operand.vmem [shape: f32[1,128], index: 2, kind: input, shape index: {}]   ;;  %s1926_s3 = inlined_call_operand.vmem [shape: bf16[256,128], index: 3, kind: output, shape index: {}]  }
   0x1   :  { %v1484_v0 = vld [vmem:[%s1923_s1 + $0x40] sm:$0xff]   ;;  %v1486_v2 = vld [vmem:[%s1923_s1 + $0x48] sm:$0xff]   ;;  %v1488_v4 = vld [vmem:[%s1923_s1 + $0x50] sm:$0xff]  }
   0x2   :  { %v1485_v1 = vld [vmem:[%s1923_s1] sm:$0xff]   ;;  %1284 = vmatprep.subr.bf16.mxu0 %v1484_v0  ;;  %1468 = vmatprep.subr.bf16.mxu1 %v1484_v0  ;;  %v1487_v3 = vld [vmem:[%s1923_s1 + $0x8] sm:$0xff]   ;;  %v1489_v5 = vld [vmem:[%s1923_s1 + $0x10] sm:$0xff]  }
   0x3   :  { %1285 = vmatpush3.bf16.msra.mxu0 %v1485_v1  ;;  %1476 = vmatpush3.bf16.msra.mxu1 %v1485_v1  ;;  %v1490_v6 = vld [vmem:[%s1923_s1 + $0x58] sm:$0xff]   ;;  %v1492_v8 = vld [vmem:[%s1923_s1 + $0x60] sm:$0xff]   ;;  %v1494_v10 = vld [vmem:[%s1923_s1 + $0x68] sm:$0xff]  }
   0x4   :  { %1286 = vmatprep.subr.bf16.mxu0 %v1486_v2  ;;  %1469 = vmatprep.subr.bf16.mxu1 %v1486_v2  ;;  %v1491_v7 = vld [vmem:[%s1923_s1 + $0x18] sm:$0xff]   ;;  %v1493_v9 = vld [vmem:[%s1923_s1 + $0x20] sm:$0xff]   ;;  %v1495_v13 = vld [vmem:[%s1923_s1 + $0x28] sm:$0xff]  }
   0x5   :  { %v1502_v11 = vld [vmem:[%s1924_s0 + $0x4] ss:$12 sps:$4 sm:$0xff]   ;;  %v1498_v16 = vld [vmem:[%s1923_s1 + $0x78] sm:$0xff]   ;;  %v1500_v19 = vld [vmem:[%s1924_s0] ss:$12 sps:$4 sm:$0xff]  }
   0x6   :  { %v1505_v12 = vld [vmem:[%s1924_s0 + $0x124] ss:$12 sps:$4 sm:$0xff]   ;;  %566 = vmatprep.mubr.bf16.mxu0 %v1502_v11  ;;  %v1499_v17 = vld [vmem:[%s1923_s1 + $0x38] sm:$0xff]   ;;  %v1503_v20 = vld [vmem:[%s1924_s0 + $0x120] ss:$12 sps:$4 sm:$0xff]  }
   0x7   :  { %1287 = vmatpush3.bf16.msra.mxu0 %v1487_v3  ;;  %1477 = vmatpush3.bf16.msra.mxu1 %v1487_v3  ;;  %v1496_v14 = vld [vmem:[%s1923_s1 + $0x70] sm:$0xff]   ;;  %v1506_v18 = vld [vmem:[%s1923_s1 + $0x80] sm:$0xff]   ;;  %v1508_v21 = vld [vmem:[%s1924_s0 + $0x1c] ss:$12 sps:$4 sm:$0xff]  }
   0x8   :  { %1288 = vmatprep.subr.bf16.mxu0 %v1488_v4  ;;  %1470 = vmatprep.subr.bf16.mxu1 %v1488_v4  ;;  %v1497_v15 = vld [vmem:[%s1923_s1 + $0x30] sm:$0xff]   ;;  %v1507_v22 = vld [vmem:[%s1923_s1 + $0x88] sm:$0xff]   ;;  %v1512_v24 = vld [vmem:[%s1924_s0 + $0x18] ss:$12 sps:$4 sm:$0xff]  }
   0x9   :  { %662 = vmatprep.mubr.bf16.mxu1 %v1505_v12  ;;  %v1510_v23 = vld [vmem:[%s1924_s0 + $0x13c] ss:$12 sps:$4 sm:$0xff]   ;;  %v1514_v25 = vld [vmem:[%s1923_s1 + $0x90] sm:$0xff]   ;;  %v1513_v26 = vld [vmem:[%s1924_s0 + $0x138] ss:$12 sps:$4 sm:$0xff]  }
   0xa   :  { %v1515_v27 = vld [vmem:[%s1923_s1 + $0x98] sm:$0xff]   ;;  %v1516_v28 = vld [vmem:[%s1924_s0 + $0x34] ss:$12 sps:$4 sm:$0xff]   ;;  %v1523_v33 = vld [vmem:[%s1923_s1 + $0xa8] sm:$0xff]  }
   0xb   :  { %1289 = vmatpush3.bf16.msra.mxu0 %v1489_v5  ;;  %1478 = vmatpush3.bf16.msra.mxu1 %v1489_v5  ;;  %v1518_v29 = vld [vmem:[%s1924_s0 + $0x154] ss:$12 sps:$4 sm:$0xff]   ;;  %v1520_v31 = vld [vmem:[%s1924_s0 + $0x30] ss:$12 sps:$4 sm:$0xff]   ;;  %v1524_v34 = vld [vmem:[%s1924_s0 + $0x4c] ss:$12 sps:$4 sm:$0xff]  }
   0xc   :  { %1290 = vmatprep.subr.bf16.mxu0 %v1490_v6  ;;  %1471 = vmatprep.subr.bf16.mxu1 %v1490_v6  ;;  %v1522_v30 = vld [vmem:[%s1923_s1 + $0xa0] sm:$0xff]   ;;  %v1521_v32 = vld [vmem:[%s1924_s0 + $0x150] ss:$12 sps:$4 sm:$0xff]   ;;  %v1526_v35 = vld [vmem:[%s1924_s0 + $0x16c] ss:$12 sps:$4 sm:$0xff]  }
   0xd   :  { %v1530_v36 = vld [vmem:[%s1923_s1 + $0xb0] sm:$0xff]   ;;  %v1531_v40 = vld [vmem:[%s1923_s1 + $0xb8] sm:$0xff]   ;;  %v1535_v42 = vld [vmem:[%s1924_s0 + $0x60] ss:$12 sps:$4 sm:$0xff]  }
   0xe   :  { %v1528_v37 = vld [vmem:[%s1924_s0 + $0x48] ss:$12 sps:$4 sm:$0xff]   ;;  %v1532_v39 = vld [vmem:[%s1924_s0 + $0x64] ss:$12 sps:$4 sm:$0xff]   ;;  %v1536_v43 = vld [vmem:[%s1924_s0 + $0x20] ss:$12 sps:$4 sm:$0xff]  }
   0xf   :  { %1291 = vmatpush3.bf16.msra.mxu0 %v1491_v7  ;;  %1479 = vmatpush3.bf16.msra.mxu1 %v1491_v7  ;;  %v1529_v38 = vld [vmem:[%s1924_s0 + $0x168] ss:$12 sps:$4 sm:$0xff]   ;;  %v1539_v45 = vld [vmem:[%s1924_s0 + $0x38] ss:$12 sps:$4 sm:$0xff]   ;;  %v1541_v47 = vld [vmem:[%s1924_s0 + $0x50] ss:$12 sps:$4 sm:$0xff]  }
  0x10   :  { %1292 = vmatprep.subr.bf16.mxu0 %v1492_v8  ;;  %1472 = vmatprep.subr.bf16.mxu1 %v1492_v8  ;;  %v1534_v41 = vld [vmem:[%s1924_s0 + $0x8] ss:$12 sps:$4 sm:$0xff]   ;;  %v1540_v46 = vld [vmem:[%s1924_s0 + $0x78] ss:$12 sps:$4 sm:$0xff]   ;;  %v1545_v50 = vld [vmem:[%s1924_s0 + $0x90] ss:$12 sps:$4 sm:$0xff]  }
  0x11   :  { %v1537_v44 = vld [vmem:[%s1924_s0 + $0x7c] ss:$12 sps:$4 sm:$0xff]   ;;  %v1542_v48 = vld [vmem:[%s1924_s0 + $0x94] ss:$12 sps:$4 sm:$0xff]   ;;  %v1547_v52 = vld [vmem:[%s1924_s0 + $0xac] ss:$12 sps:$4 sm:$0xff]  }
  0x12   :  { %v1544_v49 = vld [vmem:[%s1924_s0 + $0x68] ss:$12 sps:$4 sm:$0xff]   ;;  %v1546_v51 = vld [vmem:[%s1924_s0 + $0x80] ss:$12 sps:$4 sm:$0xff]   ;;  %v1549_v53 = vld [vmem:[%s1924_s0 + $0x98] ss:$12 sps:$4 sm:$0xff]  }
  0x13   :  { %1293 = vmatpush3.bf16.msra.mxu0 %v1493_v9  ;;  %1480 = vmatpush3.bf16.msra.mxu1 %v1493_v9  ;;  %v1550_v54 = vld [vmem:[%s1924_s0 + $0xa8] ss:$12 sps:$4 sm:$0xff]   ;;  %v1551_v55 = vld [vmem:[%s1924_s0 + $0xb0] ss:$12 sps:$4 sm:$0xff]   ;;  %v1555_v58 = vld [vmem:[%s1924_s0 + $0xc0] ss:$12 sps:$4 sm:$0xff]  }
  0x14   :  { %1294 = vmatprep.subr.bf16.mxu0 %v1494_v10  ;;  %1473 = vmatprep.subr.bf16.mxu1 %v1494_v10  ;;  %v1552_v56 = vld [vmem:[%s1924_s0 + $0xc4] ss:$12 sps:$4 sm:$0xff]   ;;  %v1554_v57 = vld [vmem:[%s1924_s0 + $0xc8] ss:$12 sps:$4 sm:$0xff]   ;;  %v1556_v59 = vld [vmem:[%s1924_s0 + $0xe0] ss:$12 sps:$4 sm:$0xff]  }
  0x15   :  { %v1557_v60 = vld [vmem:[%s1924_s0 + $0xdc] ss:$12 sps:$4 sm:$0xff]   ;;  %v1559_v61 = vld [vmem:[%s1924_s0 + $0xf8] ss:$12 sps:$4 sm:$0xff]   ;;  %v1562_v0 = vld [vmem:[%s1924_s0 + $0xf4] ss:$12 sps:$4 sm:$0xff]  }
  0x16   :  { %v1560_v62 = vld [vmem:[%s1924_s0 + $0xd8] ss:$12 sps:$4 sm:$0xff]   ;;  %v1561_v63 = vld [vmem:[%s1924_s0 + $0x110] ss:$12 sps:$4 sm:$0xff]   ;;  %v1564_v1 = vld [vmem:[%s1924_s0 + $0x128] ss:$12 sps:$4 sm:$0xff]  }
  0x17   :  { %1295 = vmatpush3.bf16.msra.mxu0 %v1495_v13  ;;  %1481 = vmatpush3.bf16.msra.mxu1 %v1495_v13  ;;  %v1565_v2 = vld [vmem:[%s1924_s0 + $0xf0] ss:$12 sps:$4 sm:$0xff]   ;;  %v1566_v3 = vld [vmem:[%s1924_s0 + $0x140] ss:$12 sps:$4 sm:$0xff]   ;;  %v1569_v5 = vld [vmem:[%s1924_s0 + $0x158] ss:$12 sps:$4 sm:$0xff]  }
  0x18   :  { %1296 = vmatprep.subr.bf16.mxu0 %v1496_v14  ;;  %1474 = vmatprep.subr.bf16.mxu1 %v1496_v14  ;;  %v1567_v4 = vld [vmem:[%s1924_s0 + $0x10c] ss:$12 sps:$4 sm:$0xff]   ;;  %v1570_v6 = vld [vmem:[%s1924_s0 + $0x108] ss:$12 sps:$4 sm:$0xff]   ;;  %v1571_v7 = vld [vmem:[%s1924_s0 + $0x170] ss:$12 sps:$4 sm:$0xff]  }
  0x1b   :  { %1297 = vmatpush3.bf16.msra.mxu0 %v1497_v15  ;;  %1482 = vmatpush3.bf16.msra.mxu1 %v1497_v15 }
  0x1c   :  { %1298 = vmatprep.subr.bf16.mxu0 %v1498_v16  ;;  %1475 = vmatprep.subr.bf16.mxu1 %v1498_v16 }
  0x1f   :  { %1299 = vmatpush3.bf16.msra.mxu0 %v1499_v17  ;;  %1483 = vmatpush3.bf16.msra.mxu1 %v1499_v17 }
  0x20   :  { %1420 = vmatprep.subr.bf16.mxu1 %v1506_v18 }
  0x22   :  { %567 = vmatmul.mubr.bf16.vlgmr.msra.gmra.mrb[0].mxu0 %v1500_v19  ;;  %663 = vmatmul.mubr.bf16.vlgmr.msra.gmra.mrb[0].mxu1 %v1503_v20 }
  0x23   :  { %1421 = vmatpush3.bf16.msra.mxu1 %v1506_v18  ;;  %574 = vmatprep.mubr.bf16.mxu0 %v1508_v21 }
  0x24   :  { %1422 = vmatprep.subr.bf16.mxu1 %v1507_v22  ;;  %670 = vmatprep.mubr.bf16.mxu1 %v1510_v23 }
  0x27   :  { %1423 = vmatpush3.bf16.msra.mxu1 %v1507_v22 }
  0x28   :  { %1424 = vmatprep.subr.bf16.mxu1 %v1514_v25 }
  0x2a   :  { %575 = vmatmul.mubr.bf16.gmra.mrb[4].mxu0 %v1512_v24  ;;  %671 = vmatmul.mubr.bf16.gmra.mrb[4].mxu1 %v1513_v26 }
  0x2b   :  { %1425 = vmatpush3.bf16.msra.mxu1 %v1514_v25  ;;  %582 = vmatprep.mubr.bf16.mxu0 %v1516_v28 }
  0x2c   :  { %1426 = vmatprep.subr.bf16.mxu1 %v1515_v27  ;;  %678 = vmatprep.mubr.bf16.mxu1 %v1518_v29 }
  0x2f   :  { %1427 = vmatpush3.bf16.msra.mxu1 %v1515_v27 }
  0x30   :  { %1428 = vmatprep.subr.bf16.mxu1 %v1522_v30 }
  0x32   :  { %583 = vmatmul.mubr.bf16.gmra.mrb[8].mxu0 %v1520_v31  ;;  %679 = vmatmul.mubr.bf16.gmra.mrb[8].mxu1 %v1521_v32 }
  0x33   :  { %1429 = vmatpush3.bf16.msra.mxu1 %v1522_v30  ;;  %590 = vmatprep.mubr.bf16.mxu0 %v1524_v34 }
  0x34   :  { %1430 = vmatprep.subr.bf16.mxu1 %v1523_v33  ;;  %686 = vmatprep.mubr.bf16.mxu1 %v1526_v35 }
  0x37   :  { %1431 = vmatpush3.bf16.msra.mxu1 %v1523_v33 }
  0x38   :  { %1432 = vmatprep.subr.bf16.mxu1 %v1530_v36 }
  0x3a   :  { %591 = vmatmul.mubr.bf16.gmra.mrb[12].mxu0 %v1528_v37  ;;  %687 = vmatmul.mubr.bf16.gmra.mrb[12].mxu1 %v1529_v38 }
  0x3b   :  { %1433 = vmatpush3.bf16.msra.mxu1 %v1530_v36  ;;  %598 = vmatprep.mubr.bf16.mxu0 %v1532_v39 }
  0x3c   :  { %1434 = vmatprep.subr.bf16.mxu1 %v1531_v40  ;;  %1436 = vmatprep.mubr.bf16.mxu1 %v1534_v41 }
  0x3f   :  { %1435 = vmatpush3.bf16.msra.mxu1 %v1531_v40 }
  0x42   :  { %599 = vmatmul.mubr.bf16.gmra.mrb[16].mxu0 %v1535_v42  ;;  %1437 = vmatmul.mubr.bf16.vlgmr.msra.gmra.mrb[16].mxu1 %v1536_v43 }
  0x43   :  { %606 = vmatprep.mubr.bf16.mxu0 %v1537_v44  ;;  %1440 = vmatprep.mubr.bf16.mxu1 %v1539_v45 }
  0x4a   :  { %607 = vmatmul.mubr.bf16.gmra.mrb[20].mxu0 %v1540_v46  ;;  %1441 = vmatmul.mubr.bf16.gmra.mrb[20].mxu1 %v1541_v47 }
  0x4b   :  { %614 = vmatprep.mubr.bf16.mxu0 %v1542_v48  ;;  %1444 = vmatprep.mubr.bf16.mxu1 %v1544_v49 }
  0x52   :  { %615 = vmatmul.mubr.bf16.gmra.mrb[24].mxu0 %v1545_v50  ;;  %1445 = vmatmul.mubr.bf16.gmra.mrb[24].mxu1 %v1546_v51 }
  0x53   :  { %622 = vmatprep.mubr.bf16.mxu0 %v1547_v52  ;;  %1448 = vmatprep.mubr.bf16.mxu1 %v1549_v53 }
  0x5a   :  { %623 = vmatmul.mubr.bf16.gmra.mrb[28].mxu0 %v1550_v54  ;;  %1449 = vmatmul.mubr.bf16.gmra.mrb[28].mxu1 %v1551_v55 }
  0x5b   :  { %630 = vmatprep.mubr.bf16.mxu0 %v1552_v56  ;;  %1452 = vmatprep.mubr.bf16.mxu1 %v1554_v57  ;;  %v1827_v56 = vld [vmem:[%s1925_s2] ss:$0 sm:$0xff] }
  0x62   :  { %631 = vmatmul.mubr.bf16.gmra.mrb[32].mxu0 %v1555_v58  ;;  %1453 = vmatmul.mubr.bf16.gmra.mrb[32].mxu1 %v1556_v59 }
  0x63   :  { %638 = vmatprep.mubr.bf16.mxu0 %v1557_v60  ;;  %1456 = vmatprep.mubr.bf16.mxu1 %v1559_v61 }
  0x6a   :  { %639 = vmatmul.mubr.bf16.gmra.mrb[36].mxu0 %v1560_v62  ;;  %1457 = vmatmul.mubr.bf16.gmra.mrb[36].mxu1 %v1561_v63 }
  0x6b   :  { %646 = vmatprep.mubr.bf16.mxu0 %v1562_v0  ;;  %1460 = vmatprep.mubr.bf16.mxu1 %v1564_v1 }
  0x72   :  { %647 = vmatmul.mubr.bf16.gmra.mrb[40].mxu0 %v1565_v2  ;;  %1461 = vmatmul.mubr.bf16.gmra.mrb[40].mxu1 %v1566_v3 }
  0x73   :  { %654 = vmatprep.mubr.bf16.mxu0 %v1567_v4  ;;  %1464 = vmatprep.mubr.bf16.mxu1 %v1569_v5 }
  0x7a   :  { %655 = vmatmul.mubr.bf16.gmra.mrb[44].mxu0 %v1570_v6  ;;  %1465 = vmatmul.mubr.bf16.gmra.mrb[44].mxu1 %v1571_v7 }
  0xf5   :  { %v1300_v8 = vpop.f32.mrb[0].mxu0  ;;  %v1372_v9 = vpop.f32.mrb[0].mxu1 }
  0xf6   :  { %v1301_v10 = vpop.f32.mrb[1].mxu0  ;;  %v1373_v11 = vpop.f32.mrb[1].mxu1 }
  0xf7   :  { %v1302_v12 = vadd.f32 %v1301_v10, %v1300_v8  ;;  %v1303_v13 = vpop.f32.mrb[2].mxu0  ;;  %v1808_v14 = vadd.f32 %v1373_v11, %v1372_v9  ;;  %v1375_v15 = vpop.f32.mrb[2].mxu1 }
  0xf8   :  { %v1304_v16 = vpop.f32.mrb[3].mxu0  ;;  %v1376_v17 = vpop.f32.mrb[3].mxu1 }
  0xf9   :  { %v1305_v18 = vadd.f32 %v1304_v16, %v1303_v13  ;;  %v1810_v19 = vadd.f32 %v1376_v17, %v1375_v15  ;;  %v569_v60 = vadd.f32 %v1302_v12, %v1827_v56 }
  0xfb   :  { %v572_v5 = vadd.f32 %v1305_v18, %v1827_v56 }
  0xfd   :  { %v1306_v20 = vpop.f32.mrb[4].mxu0  ;;  %v1378_v21 = vpop.f32.mrb[4].mxu1 }
  0xfe   :  { %v1307_v22 = vpop.f32.mrb[5].mxu0  ;;  %v1379_v23 = vpop.f32.mrb[5].mxu1 }
  0xff   :  { %v1308_v24 = vadd.f32 %v1307_v22, %v1306_v20  ;;  %v1309_v25 = vpop.f32.mrb[6].mxu0  ;;  %v1812_v26 = vadd.f32 %v1379_v23, %v1378_v21  ;;  %v1381_v27 = vpop.f32.mrb[6].mxu1 }
 0x100   :  { %v1310_v28 = vpop.f32.mrb[7].mxu0  ;;  %v1382_v29 = vpop.f32.mrb[7].mxu1 }
 0x101   :  { %v1311_v30 = vadd.f32 %v1310_v28, %v1309_v25  ;;  %v1814_v31 = vadd.f32 %v1382_v29, %v1381_v27  ;;  %v577_v57 = vadd.f32 %v1308_v24, %v1827_v56 }
 0x103   :  { %v580_v0 = vadd.f32 %v1311_v30, %v1827_v56 }
 0x105   :  { %v1312_v32 = vpop.f32.mrb[8].mxu0  ;;  %v1384_v33 = vpop.f32.mrb[8].mxu1 }
 0x106   :  { %v1313_v34 = vpop.f32.mrb[9].mxu0  ;;  %v1385_v35 = vpop.f32.mrb[9].mxu1 }
 0x107   :  { %v1314_v36 = vadd.f32 %v1313_v34, %v1312_v32  ;;  %v1315_v37 = vpop.f32.mrb[10].mxu0  ;;  %v1816_v38 = vadd.f32 %v1385_v35, %v1384_v33  ;;  %v1387_v39 = vpop.f32.mrb[10].mxu1 }
 0x108   :  { %v1316_v40 = vpop.f32.mrb[11].mxu0  ;;  %v1388_v41 = vpop.f32.mrb[11].mxu1 }
 0x109   :  { %v1317_v42 = vadd.f32 %v1316_v40, %v1315_v37  ;;  %v1818_v43 = vadd.f32 %v1388_v41, %v1387_v39  ;;  %v585_v23 = vadd.f32 %v1314_v36, %v1827_v56 }
 0x10b   :  { %v588_v33 = vadd.f32 %v1317_v42, %v1827_v56 }
 0x10d   :  { %v1318_v44 = vpop.f32.mrb[12].mxu0  ;;  %v1390_v45 = vpop.f32.mrb[12].mxu1 }
 0x10e   :  { %v1319_v46 = vpop.f32.mrb[13].mxu0  ;;  %v1391_v47 = vpop.f32.mrb[13].mxu1 }
 0x10f   :  { %v1320_v48 = vadd.f32 %v1319_v46, %v1318_v44  ;;  %v1321_v49 = vpop.f32.mrb[14].mxu0  ;;  %v1820_v50 = vadd.f32 %v1391_v47, %v1390_v45  ;;  %v1393_v51 = vpop.f32.mrb[14].mxu1 }
 0x110   :  { %v1322_v52 = vpop.f32.mrb[15].mxu0  ;;  %v1394_v53 = vpop.f32.mrb[15].mxu1 }
 0x111   :  { %v1323_v54 = vadd.f32 %v1322_v52, %v1321_v49  ;;  %v1822_v55 = vadd.f32 %v1394_v53, %v1393_v51  ;;  %v593_v17 = vadd.f32 %v1320_v48, %v1827_v56 }
 0x113   :  { %v596_v27 = vadd.f32 %v1323_v54, %v1827_v56 }
 0x115   :  { %v1324_v58 = vpop.f32.mrb[16].mxu0  ;;  %v1438_v59 = vpop.f32.mrb[16].mxu1 }
 0x116   :  { %v738_v61 = vadd.f32 %v1438_v59, %v577_v57  ;;  %v1325_v62 = vpop.f32.mrb[17].mxu0  ;;  %v729_v63 = vpop.f32.mrb[17].mxu1 }
 0x117   :  { %v1326_v1 = vadd.f32 %v1325_v62, %v1324_v58  ;;  %v730_v2 = vadd.f32 %v729_v63, %v569_v60  ;;  %v1327_v3 = vpop.f32.mrb[18].mxu0  ;;  %v1439_v4 = vpop.f32.mrb[18].mxu1 }
 0x118   :  { %v741_v6 = vadd.f32 %v1439_v4, %v580_v0  ;;  %v1328_v7 = vpop.f32.mrb[19].mxu0  ;;  %v732_v8 = vpop.f32.mrb[19].mxu1  ;;  %v858_v11 = vmax.f32 %v738_v61, 0.0 }
 0x119   :  { %v1329_v9 = vadd.f32 %v1328_v7, %v1327_v3  ;;  %v733_v10 = vadd.f32 %v732_v8, %v572_v5  ;;  %v856_v15 = vmax.f32 %v730_v2, 0.0  ;;  %v601_v52 = vadd.f32 %v1326_v1, %v1827_v56 }
 0x11a   :  { %v859_v13 = vmax.f32 %v741_v6, 0.0 }
 0x11b   :  { %v857_v12 = vmax.f32 %v733_v10, 0.0  ;;  %v604_v62 = vadd.f32 %v1329_v9, %v1827_v56 }
 0x11c   :  { %v1197_v16 = vpack.c.bf16 %v859_v13, %v858_v11 }
 0x11d   :  { %v1192_v20 = vpack.c.bf16 %v857_v12, %v856_v15  ;;  %v1330_v21 = vpop.f32.mrb[20].mxu0  ;;  %v1442_v22 = vpop.f32.mrb[20].mxu1 }
 0x11e   :  { %1269 = vst [vmem:[%s1926_s3 + $0x8] sm:$0xff] %v1197_v16   ;;  %v754_v18 = vadd.f32 %v1442_v22, %v593_v17  ;;  %v1331_v24 = vpop.f32.mrb[21].mxu0  ;;  %v745_v25 = vpop.f32.mrb[21].mxu1 }
 0x11f   :  { %1193 = vst [vmem:[%s1926_s3] sm:$0xff] %v1192_v20   ;;  %v1332_v28 = vadd.f32 %v1331_v24, %v1330_v21  ;;  %v746_v29 = vadd.f32 %v745_v25, %v585_v23  ;;  %v1333_v30 = vpop.f32.mrb[22].mxu0  ;;  %v1443_v32 = vpop.f32.mrb[22].mxu1 }
 0x120   :  { %v757_v34 = vadd.f32 %v1443_v32, %v596_v27  ;;  %v1334_v35 = vpop.f32.mrb[23].mxu0  ;;  %v748_v36 = vpop.f32.mrb[23].mxu1  ;;  %v862_v40 = vmax.f32 %v754_v18, 0.0 }
 0x121   :  { %v1335_v37 = vadd.f32 %v1334_v35, %v1333_v30  ;;  %v749_v39 = vadd.f32 %v748_v36, %v588_v33  ;;  %v860_v44 = vmax.f32 %v746_v29, 0.0  ;;  %v609_v47 = vadd.f32 %v1332_v28, %v1827_v56 }
 0x122   :  { %v863_v41 = vmax.f32 %v757_v34, 0.0 }
 0x123   :  { %v861_v45 = vmax.f32 %v749_v39, 0.0  ;;  %v612_v57 = vadd.f32 %v1335_v37, %v1827_v56 }
 0x124   :  { %v1207_v46 = vpack.c.bf16 %v863_v41, %v862_v40 }
 0x125   :  { %v1202_v48 = vpack.c.bf16 %v861_v45, %v860_v44  ;;  %v1336_v49 = vpop.f32.mrb[24].mxu0  ;;  %v1446_v51 = vpop.f32.mrb[24].mxu1 }
 0x126   :  { %1271 = vst [vmem:[%s1926_s3 + $0x18] sm:$0xff] %v1207_v46   ;;  %v770_v42 = vadd.f32 %v1446_v51, %v609_v47  ;;  %v1337_v53 = vpop.f32.mrb[25].mxu0  ;;  %v761_v54 = vpop.f32.mrb[25].mxu1 }
 0x127   :  { %1270 = vst [vmem:[%s1926_s3 + $0x10] sm:$0xff] %v1202_v48   ;;  %v1338_v58 = vadd.f32 %v1337_v53, %v1336_v49  ;;  %v762_v59 = vadd.f32 %v761_v54, %v601_v52  ;;  %v1339_v60 = vpop.f32.mrb[26].mxu0  ;;  %v1447_v61 = vpop.f32.mrb[26].mxu1 }
 0x128   :  { %v773_v63 = vadd.f32 %v1447_v61, %v612_v57  ;;  %v1340_v0 = vpop.f32.mrb[27].mxu0  ;;  %v764_v1 = vpop.f32.mrb[27].mxu1  ;;  %v866_v4 = vmax.f32 %v770_v42, 0.0 }
 0x129   :  { %v1341_v2 = vadd.f32 %v1340_v0, %v1339_v60  ;;  %v765_v3 = vadd.f32 %v764_v1, %v604_v62  ;;  %v864_v6 = vmax.f32 %v762_v59, 0.0  ;;  %v617_v15 = vadd.f32 %v1338_v58, %v1827_v56 }
 0x12a   :  { %v867_v5 = vmax.f32 %v773_v63, 0.0 }
 0x12b   :  { %v865_v7 = vmax.f32 %v765_v3, 0.0  ;;  %v620_v22 = vadd.f32 %v1341_v2, %v1827_v56 }
 0x12c   :  { %v1217_v8 = vpack.c.bf16 %v867_v5, %v866_v4 }
 0x12d   :  { %v1212_v10 = vpack.c.bf16 %v865_v7, %v864_v6  ;;  %v1342_v11 = vpop.f32.mrb[28].mxu0  ;;  %v1450_v13 = vpop.f32.mrb[28].mxu1 }
 0x12e   :  { %1273 = vst [vmem:[%s1926_s3 + $0x28] sm:$0xff] %v1217_v8   ;;  %v1343_v9 = vpop.f32.mrb[29].mxu0  ;;  %v777_v12 = vpop.f32.mrb[29].mxu1 }
 0x12f   :  { %1272 = vst [vmem:[%s1926_s3 + $0x20] sm:$0xff] %v1212_v10   ;;  %v1344_v16 = vadd.f32 %v1343_v9, %v1342_v11  ;;  %v778_v17 = vadd.f32 %v777_v12, %v617_v15  ;;  %v1345_v20 = vpop.f32.mrb[30].mxu0  ;;  %v1451_v21 = vpop.f32.mrb[30].mxu1  ;;  %v673_v10 = vadd.f32 %v1812_v26, %v1827_v56  ;;  %v665_v9 = vadd.f32 %v1808_v14, %v1827_v56 }
 0x130   :  { %v1346_v23 = vpop.f32.mrb[31].mxu0  ;;  %v780_v18 = vpop.f32.mrb[31].mxu1 }
 0x131   :  { %v625_v24 = vadd.f32 %v1344_v16, %v1827_v56  ;;  %v1347_v25 = vadd.f32 %v1346_v23, %v1345_v20  ;;  %v781_v27 = vadd.f32 %v780_v18, %v620_v22  ;;  %v868_v29 = vmax.f32 %v778_v17, 0.0 }
 0x132   :  { %v676_v20 = vadd.f32 %v1814_v31, %v1827_v56 }
 0x133   :  { %v786_v28 = vadd.f32 %v1450_v13, %v625_v24  ;;  %v628_v30 = vadd.f32 %v1347_v25, %v1827_v56  ;;  %v869_v32 = vmax.f32 %v781_v27, 0.0 }
 0x135   :  { %v789_v33 = vadd.f32 %v1451_v21, %v628_v30  ;;  %v1222_v34 = vpack.c.bf16 %v869_v32, %v868_v29  ;;  %v1348_v35 = vpop.f32.mrb[32].mxu0  ;;  %v1454_v36 = vpop.f32.mrb[32].mxu1  ;;  %v870_v40 = vmax.f32 %v786_v28, 0.0  ;;  %v668_v28 = vadd.f32 %v1810_v19, %v1827_v56 }
 0x136   :  { %v1349_v37 = vpop.f32.mrb[33].mxu0  ;;  %v793_v39 = vpop.f32.mrb[33].mxu1  ;;  %v689_v19 = vadd.f32 %v1820_v50, %v1827_v56 }
 0x137   :  { %v871_v41 = vmax.f32 %v789_v33, 0.0  ;;  %1274 = vst [vmem:[%s1926_s3 + $0x30] sm:$0xff] %v1222_v34   ;;  %v1350_v44 = vadd.f32 %v1349_v37, %v1348_v35  ;;  %v1351_v45 = vpop.f32.mrb[34].mxu0  ;;  %v1455_v46 = vpop.f32.mrb[34].mxu1 }
 0x138   :  { %v1352_v47 = vpop.f32.mrb[35].mxu0  ;;  %v796_v48 = vpop.f32.mrb[35].mxu1 }
 0x139   :  { %v1227_v49 = vpack.c.bf16 %v871_v41, %v870_v40  ;;  %v633_v51 = vadd.f32 %v1350_v44, %v1827_v56  ;;  %v1353_v52 = vadd.f32 %v1352_v47, %v1351_v45 }
 0x13b   :  { %1275 = vst [vmem:[%s1926_s3 + $0x38] sm:$0xff] %v1227_v49   ;;  %v794_v42 = vadd.f32 %v793_v39, %v633_v51  ;;  %v636_v53 = vadd.f32 %v1353_v52, %v1827_v56  ;;  %v692_v52 = vadd.f32 %v1822_v55, %v1827_v56 }
 0x13d   :  { %v797_v54 = vadd.f32 %v796_v48, %v636_v53  ;;  %v1354_v57 = vpop.f32.mrb[36].mxu0  ;;  %v1871_v58 = vpop.f32.mrb[36].mxu1  ;;  %v872_v61 = vmax.f32 %v794_v42, 0.0 }
 0x13e   :  { %v1355_v59 = vpop.f32.mrb[37].mxu0  ;;  %v809_v60 = vpop.f32.mrb[37].mxu1 }
 0x13f   :  { %v873_v62 = vmax.f32 %v797_v54, 0.0  ;;  %v1356_v63 = vadd.f32 %v1355_v59, %v1354_v57  ;;  %v1357_v0 = vpop.f32.mrb[38].mxu0  ;;  %v1873_v1 = vpop.f32.mrb[38].mxu1 }
 0x140   :  { %v1358_v2 = vpop.f32.mrb[39].mxu0  ;;  %v812_v3 = vpop.f32.mrb[39].mxu1 }
 0x141   :  { %v1232_v4 = vpack.c.bf16 %v873_v62, %v872_v61  ;;  %v641_v5 = vadd.f32 %v1356_v63, %v1827_v56  ;;  %v1359_v6 = vadd.f32 %v1358_v2, %v1357_v0  ;;  %v684_v61 = vadd.f32 %v1818_v43, %v1827_v56 }
 0x143   :  { %1276 = vst [vmem:[%s1926_s3 + $0x40] sm:$0xff] %v1232_v4   ;;  %v802_v7 = vadd.f32 %v1454_v36, %v641_v5  ;;  %v644_v8 = vadd.f32 %v1359_v6, %v1827_v56 }
 0x145   :  { %v805_v11 = vadd.f32 %v1455_v46, %v644_v8  ;;  %v1360_v13 = vpop.f32.mrb[40].mxu0  ;;  %v1462_v15 = vpop.f32.mrb[40].mxu1  ;;  %v874_v21 = vmax.f32 %v802_v7, 0.0  ;;  %v681_v46 = vadd.f32 %v1816_v38, %v1827_v56 }
 0x146   :  { %v834_v12 = vadd.f32 %v1462_v15, %v673_v10  ;;  %v1361_v16 = vpop.f32.mrb[41].mxu0  ;;  %v825_v17 = vpop.f32.mrb[41].mxu1 }
 0x147   :  { %v875_v22 = vmax.f32 %v805_v11, 0.0  ;;  %v1362_v23 = vadd.f32 %v1361_v16, %v1360_v13  ;;  %v826_v18 = vadd.f32 %v825_v17, %v665_v9  ;;  %v1363_v24 = vpop.f32.mrb[42].mxu0  ;;  %v1463_v25 = vpop.f32.mrb[42].mxu1 }
 0x148   :  { %v837_v27 = vadd.f32 %v1463_v25, %v676_v20  ;;  %v1364_v26 = vpop.f32.mrb[43].mxu0  ;;  %v828_v29 = vpop.f32.mrb[43].mxu1  ;;  %v882_v33 = vmax.f32 %v834_v12, 0.0 }
 0x149   :  { %v1237_v30 = vpack.c.bf16 %v875_v22, %v874_v21  ;;  %v649_v14 = vadd.f32 %v1362_v23, %v1827_v56  ;;  %v1365_v32 = vadd.f32 %v1364_v26, %v1363_v24  ;;  %v829_v35 = vadd.f32 %v828_v29, %v668_v28 }
 0x14a   :  { %v883_v34 = vmax.f32 %v837_v27, 0.0  ;;  %v880_v37 = vmax.f32 %v826_v18, 0.0 }
 0x14b   :  { %1277 = vst [vmem:[%s1926_s3 + $0x48] sm:$0xff] %v1237_v30   ;;  %v810_v31 = vadd.f32 %v809_v60, %v649_v14  ;;  %v652_v36 = vadd.f32 %v1365_v32, %v1827_v56  ;;  %v881_v40 = vmax.f32 %v829_v35, 0.0 }
 0x14c   :  { %v1257_v39 = vpack.c.bf16 %v883_v34, %v882_v33 }
 0x14d   :  { %v813_v41 = vadd.f32 %v812_v3, %v652_v36  ;;  %v1366_v44 = vpop.f32.mrb[44].mxu0  ;;  %v1466_v45 = vpop.f32.mrb[44].mxu1  ;;  %v1252_v47 = vpack.c.bf16 %v881_v40, %v880_v37  ;;  %v876_v42 = vmax.f32 %v810_v31, 0.0 }
 0x14e   :  { %1281 = vst [vmem:[%s1926_s3 + $0x68] sm:$0xff] %v1257_v39   ;;  %v850_v48 = vadd.f32 %v1466_v45, %v689_v19  ;;  %v1367_v49 = vpop.f32.mrb[45].mxu0  ;;  %v841_v51 = vpop.f32.mrb[45].mxu1 }
 0x14f   :  { %v877_v53 = vmax.f32 %v813_v41, 0.0  ;;  %v1368_v50 = vadd.f32 %v1367_v49, %v1366_v44  ;;  %v842_v54 = vadd.f32 %v841_v51, %v681_v46  ;;  %v1369_v57 = vpop.f32.mrb[46].mxu0  ;;  %v1467_v59 = vpop.f32.mrb[46].mxu1  ;;  %1280 = vst [vmem:[%s1926_s3 + $0x60] sm:$0xff] %v1252_v47  }
 0x150   :  { %v853_v38 = vadd.f32 %v1467_v59, %v692_v52  ;;  %v1370_v60 = vpop.f32.mrb[47].mxu0  ;;  %v844_v62 = vpop.f32.mrb[47].mxu1  ;;  %v886_v2 = vmax.f32 %v850_v48, 0.0 }
 0x151   :  { %v1242_v63 = vpack.c.bf16 %v877_v53, %v876_v42  ;;  %v657_v0 = vadd.f32 %v1368_v50, %v1827_v56  ;;  %v1371_v55 = vadd.f32 %v1370_v60, %v1369_v57  ;;  %v845_v4 = vadd.f32 %v844_v62, %v684_v61 }
 0x152   :  { %v887_v3 = vmax.f32 %v853_v38, 0.0  ;;  %v884_v7 = vmax.f32 %v842_v54, 0.0 }
 0x153   :  { %1278 = vst [vmem:[%s1926_s3 + $0x50] sm:$0xff] %v1242_v63   ;;  %v818_v5 = vadd.f32 %v1871_v58, %v657_v0  ;;  %v660_v6 = vadd.f32 %v1371_v55, %v1827_v56  ;;  %v885_v10 = vmax.f32 %v845_v4, 0.0 }
 0x154   :  { %v1267_v8 = vpack.c.bf16 %v887_v3, %v886_v2 }
 0x155   :  { %v821_v43 = vadd.f32 %v1873_v1, %v660_v6  ;;  %v1262_v11 = vpack.c.bf16 %v885_v10, %v884_v7  ;;  %v878_v13 = vmax.f32 %v818_v5, 0.0 }
 0x156   :  { %1283 = vst [vmem:[%s1926_s3 + $0x78] sm:$0xff] %v1267_v8  }
 0x157   :  { %v879_v15 = vmax.f32 %v821_v43, 0.0  ;;  %1282 = vst [vmem:[%s1926_s3 + $0x70] sm:$0xff] %v1262_v11  }
 0x159   :  { %v1247_v9 = vpack.c.bf16 %v879_v15, %v878_v13 }
 0x15b   :  { %1279 = vst [vmem:[%s1926_s3 + $0x58] sm:$0xff] %v1247_v9  }

// kernel: forward.6
= control target key start
LH: loop header
LB: loop body
LE: loop exit
PB: predicated region body
PF: predicated region fallthrough
CT: control target
= control target key end

     0   :  { %s1124_s18 = smov 0   ;;  %s1126_s19 = smov 0   ;;  %s1309_s0 = inlined_call_operand.vmem [shape: bf16[2,2,2,32,128], index: 0, kind: input, shape index: {}, may-alias: {0,1}]   ;;  %s1310_s1 = inlined_call_operand.vmem [shape: bf16[2,2,2,32,128], index: 1, kind: input, shape index: {}, may-alias: {0,1}]   ;;  %s1311_s2 = inlined_call_operand.vmem [shape: bf16[128,160], index: 2, kind: input, shape index: {}]   ;;  %s1312_s3 = inlined_call_operand.vmem [shape: bf16[128,160], index: 3, kind: input, shape index: {}]   ;;  %s1313_s4 = inlined_call_operand.vmem [shape: f32[1,160], index: 4, kind: input, shape index: {}]   ;;  %s1314_s5 = inlined_call_operand.vmem [shape: bf16[2,2,32,160], index: 5, kind: output, shape index: {}]  }
   0x1   :  { %s1128_s20 = smov 0   ;;  %s1130_s21 = smov 0  }
   0x2   :  { %s1132_s22 = smov 0  }
   0x3 LB: > { %s30_s23 = sadd.s32 1, %s1083_s20  ;;  %s34_s24 = sadd.s32 1, %s1087_s21  ;;  %s1091_s22 = sphi %s1132_s22, %s15_s22   ;;  %s1087_s21 = sphi %s1130_s21, %s1320_s21   ;;  %s1083_s20 = sphi %s1128_s20, %s1319_s20   ;;  %s1079_s19 = sphi %s1126_s19, %s1318_s19   ;;  %s1075_s18 = sphi %s1124_s18, %s1317_s18  }
   0x4   : > { %p32_p0 = scmp.ge.s32.totalorder %s30_s23, 2  ;;  %p892_p1 = scmp.ge.s32.totalorder %s1091_s22, 1 }
   0x5   : > { %p247_p2 = scmp.lt.s32.totalorder %s1091_s22, 5 }
   0x6   : > { %s1322_s23 = smov (%p32_p0, %s30_s23), 0  ;;  %s1324_s24 = smov (!%p32_p0, %s34_s24), %s1087_s21 }
   0x7   : > { %p248_p3 = pnand %p892_p1, %p247_p2  ;;  %p36_p4 = scmp.ge.s32.totalorder %s1324_s24, 2 }
   0x8   : > { %v1001_v0 = vld [vmem:[%s1312_s3 + $0x4] ss:$8 sps:$4 sm:$0xff] (!%p248_p3)   ;;  %p307_p5 = scmp.lt.s32.totalorder (!%p248_p3), %s1079_s19, 1  ;;  %v1093_v2 = vmov (!%p248_p3), 0   ;;  %p309_p6 = scmp.lt.s32.totalorder (!%p248_p3), %s1075_s18, 1  ;;  %v683_v37 = vlaneseq (!%p248_p3)  ;;  %vm733_vm0 = vcmask (!%p248_p3), 1043456  }
   0x9   : > { %s1326_s24 = smov (%p36_p4, %s1324_s24), 0  ;;  %251 = sbr.rel (%p248_p3) target bundleno = 275 (0x113), region = 40 }
   0xa   : > { %v1003_v1 = vld [vmem:[%s1311_s2 + $0x4] ss:$8 sps:$4 sm:$0xff] (!%p248_p3)   ;;  %515 = vmatprep.mubr.bf16.mxu1 (!%p248_p3), %v1093_v2  ;;  %660 = vmatprep.mubr.bf16.mxu0 (!%p248_p3), %v1093_v2  ;;  %v1005_v3 = vld [vmem:[%s1312_s3] ss:$8 sps:$4 sm:$0xff] (!%p248_p3)   ;;  %v1007_v5 = vld [vmem:[%s1312_s3 + $0x14] ss:$8 sps:$4 sm:$0xff] (!%p248_p3)  }
   0xb   : > { %483 = vmatprep.subr.bf16.mxu1 (!%p248_p3), %v1001_v0  ;;  %v1006_v4 = vld [vmem:[%s1311_s2] ss:$8 sps:$4 sm:$0xff] (!%p248_p3)   ;;  %628 = vmatprep.subr.bf16.mxu0 (!%p248_p3), %v1003_v1  ;;  %v1009_v6 = vld [vmem:[%s1311_s2 + $0x14] ss:$8 sps:$4 sm:$0xff] (!%p248_p3)   ;;  %v1011_v7 = vld [vmem:[%s1312_s3 + $0x10] ss:$8 sps:$4 sm:$0xff] (!%p248_p3)  }
   0xc   : > { %484 = vmatpush1.bf16.msra.mxu1 (!%p248_p3), %v1005_v3  ;;  %629 = vmatpush1.bf16.msra.mxu0 (!%p248_p3), %v1006_v4  ;;  %v1012_v8 = vld [vmem:[%s1311_s2 + $0x10] ss:$8 sps:$4 sm:$0xff] (!%p248_p3)   ;;  %v1013_v9 = vld [vmem:[%s1312_s3 + $0x24] ss:$8 sps:$4 sm:$0xff] (!%p248_p3)   ;;  %v1017_v11 = vld [vmem:[%s1312_s3 + $0x20] ss:$8 sps:$4 sm:$0xff] (!%p248_p3)  }
   0xd   : > { %485 = vmatprep.subr.bf16.mxu1 (!%p248_p3), %v1007_v5  ;;  %630 = vmatprep.subr.bf16.mxu0 (!%p248_p3), %v1009_v6  ;;  %v1015_v10 = vld [vmem:[%s1311_s2 + $0x24] ss:$8 sps:$4 sm:$0xff] (!%p248_p3)   ;;  %v1018_v12 = vld [vmem:[%s1311_s2 + $0x20] ss:$8 sps:$4 sm:$0xff] (!%p248_p3)   ;;  %v1019_v13 = vld [vmem:[%s1312_s3 + $0x34] ss:$8 sps:$4 sm:$0xff] (!%p248_p3)  }
   0xe   : > { %v1021_v14 = vld [vmem:[%s1311_s2 + $0x34] ss:$8 sps:$4 sm:$0xff] (!%p248_p3)   ;;  %v1023_v15 = vld [vmem:[%s1312_s3 + $0x30] ss:$8 sps:$4 sm:$0xff] (!%p248_p3)   ;;  %v1025_v17 = vld [vmem:[%s1312_s3 + $0x44] ss:$8 sps:$4 sm:$0xff] (!%p248_p3)  }
   0xf   : > { %v1024_v16 = vld [vmem:[%s1311_s2 + $0x30] ss:$8 sps:$4 sm:$0xff] (!%p248_p3)   ;;  %v1027_v18 = vld [vmem:[%s1311_s2 + $0x44] ss:$8 sps:$4 sm:$0xff] (!%p248_p3)   ;;  %v1029_v19 = vld [vmem:[%s1312_s3 + $0x40] ss:$8 sps:$4 sm:$0xff] (!%p248_p3)  }
  0x10   : > { %s1328_s19 = smov (!%p307_p5, %s1079_s19), 1  ;;  %s1330_s18 = smov (!%p309_p6, %s1075_s18), 1  ;;  %486 = vmatpush1.bf16.msra.mxu1 %v1011_v7  ;;  %631 = vmatpush1.bf16.msra.mxu0 %v1012_v8  ;;  %v1030_v20 = vld [vmem:[%s1311_s2 + $0x40] ss:$8 sps:$4 sm:$0xff]   ;;  %v1031_v21 = vld [vmem:[%s1312_s3 + $0x54] ss:$8 sps:$4 sm:$0xff]  }
  0x11   : > { %s894_s16 = sshll.u32 %s1328_s19, 4  ;;  %s899_s17 = sshll.u32 %s1330_s18, 3  ;;  %487 = vmatprep.subr.bf16.mxu1 %v1013_v9  ;;  %632 = vmatprep.subr.bf16.mxu0 %v1015_v10  ;;  %v1033_v22 = vld [vmem:[%s1311_s2 + $0x54] ss:$8 sps:$4 sm:$0xff]   ;;  %v1035_v23 = vld [vmem:[%s1312_s3 + $0x50] ss:$8 sps:$4 sm:$0xff]  }
  0x12   : > { %s1189_s27 = sadd.s32 %s899_s17, %s894_s16  ;;  %s893_s14 = sshll.u32 %s1330_s18, 2  ;;  %v1036_v24 = vld [vmem:[%s1311_s2 + $0x50] ss:$8 sps:$4 sm:$0xff]   ;;  %v1037_v25 = vld [vmem:[%s1312_s3 + $0x64] ss:$8 sps:$4 sm:$0xff]   ;;  %v684_v38 = vshrl.u32 %v683_v37, 7 }
  0x13   : > { %s316_s30 = sadd.s32 %s894_s16, %s893_s14  ;;  %v1039_v26 = vld [vmem:[%s1311_s2 + $0x64] ss:$8 sps:$4 sm:$0xff]   ;;  %v1041_v27 = vld [vmem:[%s1312_s3 + $0x60] ss:$8 sps:$4 sm:$0xff]   ;;  %v1043_v29 = vld [vmem:[%s1312_s3 + $0x74] ss:$8 sps:$4 sm:$0xff]  }
  0x14   : > { %488 = vmatpush1.bf16.msra.mxu1 %v1017_v11  ;;  %633 = vmatpush1.bf16.msra.mxu0 %v1018_v12  ;;  %s895_s16 = sshll.u32 %s316_s30, 2  ;;  %v1042_v28 = vld [vmem:[%s1311_s2 + $0x60] ss:$8 sps:$4 sm:$0xff]   ;;  %v1045_v30 = vld [vmem:[%s1311_s2 + $0x74] ss:$8 sps:$4 sm:$0xff]   ;;  %v685_v39 = vsub.s32 0, %v684_v38 }
  0x15   : > { %489 = vmatprep.subr.bf16.mxu1 %v1019_v13  ;;  %634 = vmatprep.subr.bf16.mxu0 %v1021_v14  ;;  %s824_s29 = scalar_lea.vmem %s1310_s1, %s895_s16  ;;  %s318_s8 = scalar_lea.vmem %s1309_s0, %s895_s16  ;;  %v1047_v31 = vld [vmem:[%s1312_s3 + $0x70] ss:$8 sps:$4 sm:$0xff]   ;;  %v681_v40 = vld [vmem:[%s1313_s4] sm:$0x3]  ;;  %v689_v41 = vsub.s32 1, %v684_v38  ;;  %vm734_vm1 = vcmask 261124  }
  0x16   : > { %v1048_v32 = vld [vmem:[%s1311_s2 + $0x70] ss:$8 sps:$4 sm:$0xff]   ;;  %v1049_v33 = vld [vmem:[%s824_s29 + $0x20] sm:$0xff]   ;;  %v1051_v35 = vld [vmem:[%s824_s29 + $0x28] sm:$0xff]   ;;  %v686_v42 = vrot.slane %v681_v40, %v685_v39  ;;  %s901_s29 = sshll.u32 %s1189_s27, 2 }
  0x17   : > { %v1050_v34 = vld [vmem:[%s318_s8] sm:$0xff]   ;;  %v1052_v36 = vld [vmem:[%s318_s8 + $0x8] sm:$0xff]   ;;  %v690_v45 = vrot.slane %v681_v40, %v689_v41  ;;  %s1276_s18 = scalar_lea.vmem %s1314_s5, %s901_s29  ;;  %vm1278_vm2 = vmor %vm734_vm1, %vm733_vm0 }
  0x18   : > { %490 = vmatpush1.bf16.msra.mxu1 %v1023_v15  ;;  %635 = vmatpush1.bf16.msra.mxu0 %v1024_v16 }
  0x19   : > { %491 = vmatprep.subr.bf16.mxu1 %v1025_v17  ;;  %636 = vmatprep.subr.bf16.mxu0 %v1027_v18 }
  0x1c   : > { %492 = vmatpush1.bf16.msra.mxu1 %v1029_v19  ;;  %637 = vmatpush1.bf16.msra.mxu0 %v1030_v20 }
  0x1d   : > { %493 = vmatprep.subr.bf16.mxu1 %v1031_v21  ;;  %638 = vmatprep.subr.bf16.mxu0 %v1033_v22 }
  0x20   : > { %494 = vmatpush1.bf16.msra.mxu1 %v1035_v23  ;;  %639 = vmatpush1.bf16.msra.mxu0 %v1036_v24 }
  0x21   : > { %495 = vmatprep.subr.bf16.mxu1 %v1037_v25  ;;  %640 = vmatprep.subr.bf16.mxu0 %v1039_v26 }
  0x24   : > { %496 = vmatpush1.bf16.msra.mxu1 %v1041_v27  ;;  %641 = vmatpush1.bf16.msra.mxu0 %v1042_v28 }
  0x25   : > { %497 = vmatprep.subr.bf16.mxu1 %v1043_v29  ;;  %642 = vmatprep.subr.bf16.mxu0 %v1045_v30 }
  0x28   : > { %498 = vmatpush1.bf16.msra.mxu1 %v1047_v31  ;;  %643 = vmatpush1.bf16.msra.mxu0 %v1048_v32 }
  0x2b   : > { %516 = vmatmul.mubr.bf16.vlgmr.msra.gmra.mrb[0].mxu1 %v1049_v33  ;;  %661 = vmatmul.mubr.bf16.vlgmr.msra.gmra.mrb[0].mxu0 %v1050_v34 }
  0x2c   : > { %525 = vmatprep.mubr.bf16.mxu1 %v1093_v2  ;;  %670 = vmatprep.mubr.bf16.mxu0 %v1093_v2 }
  0x33   : > { %526 = vmatmul.mubr.bf16.gmra.mrb[4].mxu1 %v1051_v35  ;;  %671 = vmatmul.mubr.bf16.gmra.mrb[4].mxu0 %v1052_v36 }
  0xfe   : > { %v517_v43 = vpop.f32.mrb[0].mxu1  ;;  %v662_v44 = vpop.f32.mrb[0].mxu0 }
  0xff   : > { %v663_v46 = vadd.f32 %v662_v44, %v517_v43  ;;  %v519_v47 = vpop.f32.mrb[1].mxu1  ;;  %v664_v48 = vpop.f32.mrb[1].mxu0 }
 0x100   : > { %v665_v49 = vadd.f32 %v664_v48, %v519_v47  ;;  %v521_v50 = vpop.f32.mrb[2].mxu1  ;;  %v666_v51 = vpop.f32.mrb[2].mxu0 }
 0x101   : > { %v693_v52 = vadd.f32 %v686_v42, %v663_v46  ;;  %v667_v53 = vadd.f32 %v666_v51, %v521_v50  ;;  %v523_v54 = vpop.f32.mrb[3].mxu1  ;;  %v668_v55 = vpop.f32.mrb[3].mxu0 }
 0x102   : > { %v694_v56 = vadd.f32 %v690_v45, %v665_v49  ;;  %v669_v57 = vadd.f32 %v668_v55, %v523_v54 }
 0x103   : > { %v701_v58 = vmax.f32 %v693_v52, 0.0  ;;  %v695_v59 = vadd.f32 %v686_v42, %v667_v53 }
 0x104   : > { %v702_v60 = vmax.f32 %v694_v56, 0.0  ;;  %v696_v61 = vadd.f32 %v690_v45, %v669_v57 }
 0x105   : > { %v703_v63 = vmax.f32 %v695_v59, 0.0 }
 0x106   : > { %v948_v0 = vpack.c.bf16 %v702_v60, %v701_v58  ;;  %v704_v1 = vmax.f32 %v696_v61, 0.0  ;;  %v527_v2 = vpop.f32.mrb[4].mxu1  ;;  %v672_v3 = vpop.f32.mrb[4].mxu0 }
 0x107   : > { %v673_v4 = vadd.f32 %v672_v3, %v527_v2  ;;  %v529_v5 = vpop.f32.mrb[5].mxu1  ;;  %v674_v6 = vpop.f32.mrb[5].mxu0 }
 0x108   : > { %736 = vst.msk [vmem:[%s1276_s18] sm:$0xff] %vm1278_vm2, %v948_v0  ;;  %v949_v7 = vpack.c.bf16 %v704_v1, %v703_v63  ;;  %v675_v8 = vadd.f32 %v674_v6, %v529_v5  ;;  %v531_v9 = vpop.f32.mrb[6].mxu1  ;;  %v676_v10 = vpop.f32.mrb[6].mxu0 }
 0x109   : > { %v697_v11 = vadd.f32 %v686_v42, %v673_v4  ;;  %v677_v12 = vadd.f32 %v676_v10, %v531_v9  ;;  %v533_v13 = vpop.f32.mrb[7].mxu1  ;;  %v678_v14 = vpop.f32.mrb[7].mxu0 }
 0x10a   : > { %737 = vst.msk [vmem:[%s1276_s18 + $0x8] sm:$0xff] %vm1278_vm2, %v949_v7  ;;  %v698_v15 = vadd.f32 %v690_v45, %v675_v8  ;;  %v679_v16 = vadd.f32 %v678_v14, %v533_v13 }
 0x10b   : > { %v705_v17 = vmax.f32 %v697_v11, 0.0  ;;  %v699_v18 = vadd.f32 %v686_v42, %v677_v12 }
 0x10c   : > { %v706_v19 = vmax.f32 %v698_v15, 0.0  ;;  %v700_v20 = vadd.f32 %v690_v45, %v679_v16 }
 0x10d   : > { %v707_v21 = vmax.f32 %v699_v18, 0.0 }
 0x10e   : > { %v950_v22 = vpack.c.bf16 %v706_v19, %v705_v17  ;;  %v708_v23 = vmax.f32 %v700_v20, 0.0 }
 0x110   : > { %738 = vst.msk [vmem:[%s1276_s18 + $0x10] sm:$0xff] %vm1278_vm2, %v950_v22  ;;  %v951_v24 = vpack.c.bf16 %v708_v23, %v707_v21 }
 0x112   : > { %739 = vst.msk [vmem:[%s1276_s18 + $0x18] sm:$0xff] %vm1278_vm2, %v951_v24 }
 0x113 PF: > { %s15_s22 = sadd.s32 1, %s1091_s22   ;;  %s1317_s18 = smov %s1083_s20 }
 0x114   : > { %p12_p7 = scmp.ge.s32.totalorder %s15_s22, 6   ;;  %s1318_s19 = smov %s1087_s21 }
 0x115   : > { %s1319_s20 = smov %s1322_s23  ;;  %s1320_s21 = smov %s1326_s24 }
 0x116   :  { %14 = sbr.rel (!%p12_p7) target bundleno = 3 (0x3), region = 73 }

// kernel: forward.7
= control target key start
LH: loop header
LB: loop body
LE: loop exit
PB: predicated region body
PF: predicated region fallthrough
CT: control target
= control target key end

     0   :  { %s2787_s24 = smov 0   ;;  %s2789_s25 = smov 0   ;;  %s3425_s0 = inlined_call_operand.vmem [shape: bf16[2,2,16,320], index: 0, kind: input, shape index: {}, may-alias: {0,1}]   ;;  %s3426_s1 = inlined_call_operand.vmem [shape: bf16[2,2,16,320], index: 1, kind: input, shape index: {}, may-alias: {0,1}]   ;;  %s3427_s2 = inlined_call_operand.vmem [shape: bf16[320,400], index: 2, kind: input, shape index: {}]   ;;  %s3428_s3 = inlined_call_operand.vmem [shape: bf16[320,400], index: 3, kind: input, shape index: {}]   ;;  %s3429_s4 = inlined_call_operand.vmem [shape: f32[1,400], index: 4, kind: input, shape index: {}]   ;;  %s3430_s5 = inlined_call_operand.vmem [shape: bf16[400,64], index: 5, kind: input, shape index: {}]   ;;  %s3431_s6 = inlined_call_operand.vmem [shape: f32[1,64], index: 6, kind: input, shape index: {}]   ;;  %s3432_s7 = inlined_call_operand.vmem [shape: f32[2,16,64], index: 7, kind: output, shape index: {}]  }
   0x1   :  { %s2791_s26 = smov 0  }
   0x2 LB: > { %s29_s27 = sadd.s32 1, %s2740_s25  ;;  %p2168_p0 = scmp.ge.s32.totalorder %s2744_s26, 1  ;;  %s2744_s26 = sphi %s2791_s26, %s17_s26   ;;  %s2740_s25 = sphi %s2789_s25, %s3434_s25   ;;  %s2736_s24 = sphi %s2787_s24, %s3433_s24  }
   0x3   : > { %p31_p1 = scmp.ge.s32.totalorder %s29_s27, 2  ;;  %p278_p2 = scmp.lt.s32.totalorder %s2744_s26, 3 }
   0x5   : > { %s3436_s27 = smov (%p31_p1, %s29_s27), 0  ;;  %p279_p3 = pnand %p2168_p0, %p278_p2 }
   0x6   : > { %v2449_v0 = vld [vmem:[%s3428_s3 + $0x4] ss:$16 sps:$4 sm:$0xff] (!%p279_p3)   ;;  %v2451_v1 = vld [vmem:[%s3428_s3 + $0xc] ss:$16 sps:$4 sm:$0xff] (!%p279_p3)   ;;  %v2453_v2 = vld [vmem:[%s3428_s3] ss:$16 sps:$4 sm:$0xff] (!%p279_p3)  }
   0x7   : > { %282 = sbr.rel (%p279_p3) target bundleno = 611 (0x263), region = 48  ;;  %951 = vmatprep.subr.bf16.mxu0 (!%p279_p3), %v2449_v0  ;;  %v2454_v3 = vld [vmem:[%s3428_s3 + $0x8] ss:$16 sps:$4 sm:$0xff] (!%p279_p3)   ;;  %1037 = vmatprep.subr.bf16.mxu1 (!%p279_p3), %v2451_v1  ;;  %v2455_v4 = vld [vmem:[%s3428_s3 + $0x24] ss:$16 sps:$4 sm:$0xff] (!%p279_p3)   ;;  %p331_p4 = scmp.lt.s32.totalorder (!%p279_p3), %s2736_s24, 1 }
   0x8   : > { %952 = vmatpush1.bf16.msra.mxu0 (!%p279_p3), %v2453_v2  ;;  %1038 = vmatpush1.bf16.msra.mxu1 (!%p279_p3), %v2454_v3  ;;  %v2457_v5 = vld [vmem:[%s3428_s3 + $0x2c] ss:$16 sps:$4 sm:$0xff] (!%p279_p3)   ;;  %v2459_v6 = vld [vmem:[%s3428_s3 + $0x20] ss:$16 sps:$4 sm:$0xff] (!%p279_p3)   ;;  %v2460_v7 = vld [vmem:[%s3428_s3 + $0x28] ss:$16 sps:$4 sm:$0xff] (!%p279_p3)  }
   0x9   : > { %953 = vmatprep.subr.bf16.mxu0 (!%p279_p3), %v2455_v4  ;;  %1039 = vmatprep.subr.bf16.mxu1 (!%p279_p3), %v2457_v5  ;;  %v2461_v8 = vld [vmem:[%s3428_s3 + $0x44] ss:$16 sps:$4 sm:$0xff] (!%p279_p3)   ;;  %v2463_v9 = vld [vmem:[%s3428_s3 + $0x4c] ss:$16 sps:$4 sm:$0xff] (!%p279_p3)   ;;  %v2465_v10 = vld [vmem:[%s3428_s3 + $0x40] ss:$16 sps:$4 sm:$0xff] (!%p279_p3)  }
   0xa   : > { %v2466_v11 = vld [vmem:[%s3428_s3 + $0x48] ss:$16 sps:$4 sm:$0xff] (!%p279_p3)   ;;  %v2467_v12 = vld [vmem:[%s3428_s3 + $0x64] ss:$16 sps:$4 sm:$0xff] (!%p279_p3)   ;;  %v2469_v13 = vld [vmem:[%s3428_s3 + $0x6c] ss:$16 sps:$4 sm:$0xff] (!%p279_p3)  }
   0xb   : > { %v2471_v14 = vld [vmem:[%s3428_s3 + $0x60] ss:$16 sps:$4 sm:$0xff] (!%p279_p3)   ;;  %v2472_v15 = vld [vmem:[%s3428_s3 + $0x68] ss:$16 sps:$4 sm:$0xff] (!%p279_p3)   ;;  %v2473_v16 = vld [vmem:[%s3428_s3 + $0x84] ss:$16 sps:$4 sm:$0xff] (!%p279_p3)  }
   0xc   : > { %954 = vmatpush1.bf16.msra.mxu0 (!%p279_p3), %v2459_v6  ;;  %1040 = vmatpush1.bf16.msra.mxu1 (!%p279_p3), %v2460_v7  ;;  %v2475_v17 = vld [vmem:[%s3428_s3 + $0x8c] ss:$16 sps:$4 sm:$0xff] (!%p279_p3)   ;;  %v2477_v18 = vld [vmem:[%s3428_s3 + $0x80] ss:$16 sps:$4 sm:$0xff] (!%p279_p3)   ;;  %v2478_v19 = vld [vmem:[%s3428_s3 + $0x88] ss:$16 sps:$4 sm:$0xff] (!%p279_p3)  }
   0xd   : > { %955 = vmatprep.subr.bf16.mxu0 (!%p279_p3), %v2461_v8  ;;  %1041 = vmatprep.subr.bf16.mxu1 (!%p279_p3), %v2463_v9  ;;  %v2479_v20 = vld [vmem:[%s3428_s3 + $0xa4] ss:$16 sps:$4 sm:$0xff] (!%p279_p3)   ;;  %v2481_v21 = vld [vmem:[%s3428_s3 + $0xac] ss:$16 sps:$4 sm:$0xff] (!%p279_p3)   ;;  %v2483_v22 = vld [vmem:[%s3428_s3 + $0xa0] ss:$16 sps:$4 sm:$0xff] (!%p279_p3)  }
   0xe   : > { %v2484_v23 = vld [vmem:[%s3428_s3 + $0xa8] ss:$16 sps:$4 sm:$0xff]   ;;  %v2485_v24 = vld [vmem:[%s3428_s3 + $0xc4] ss:$16 sps:$4 sm:$0xff]   ;;  %v2487_v25 = vld [vmem:[%s3428_s3 + $0xcc] ss:$16 sps:$4 sm:$0xff]  }
   0xf   : > { %v2489_v26 = vld [vmem:[%s3428_s3 + $0xc0] ss:$16 sps:$4 sm:$0xff]   ;;  %v2490_v27 = vld [vmem:[%s3428_s3 + $0xc8] ss:$16 sps:$4 sm:$0xff]   ;;  %v2491_v28 = vld [vmem:[%s3428_s3 + $0xe4] ss:$16 sps:$4 sm:$0xff]  }
  0x10   : > { %956 = vmatpush1.bf16.msra.mxu0 %v2465_v10  ;;  %1042 = vmatpush1.bf16.msra.mxu1 %v2466_v11  ;;  %v2493_v29 = vld [vmem:[%s3428_s3 + $0xec] ss:$16 sps:$4 sm:$0xff]   ;;  %v2495_v30 = vld [vmem:[%s3428_s3 + $0xe0] ss:$16 sps:$4 sm:$0xff]   ;;  %v2496_v31 = vld [vmem:[%s3428_s3 + $0xe8] ss:$16 sps:$4 sm:$0xff]  }
  0x11   : > { %957 = vmatprep.subr.bf16.mxu0 %v2467_v12  ;;  %1043 = vmatprep.subr.bf16.mxu1 %v2469_v13  ;;  %v2497_v32 = vld [vmem:[%s3428_s3 + $0x104] ss:$16 sps:$4 sm:$0xff]   ;;  %v2499_v33 = vld [vmem:[%s3428_s3 + $0x10c] ss:$16 sps:$4 sm:$0xff]   ;;  %v2501_v34 = vld [vmem:[%s3428_s3 + $0x100] ss:$16 sps:$4 sm:$0xff]  }
  0x12   : > { %v2502_v35 = vld [vmem:[%s3428_s3 + $0x108] ss:$16 sps:$4 sm:$0xff]   ;;  %v2503_v36 = vld [vmem:[%s3428_s3 + $0x124] ss:$16 sps:$4 sm:$0xff]   ;;  %v2505_v37 = vld [vmem:[%s3428_s3 + $0x12c] ss:$16 sps:$4 sm:$0xff]  }
  0x13   : > { %s3438_s24 = smov (!%p331_p4, %s2736_s24), 1  ;;  %v2507_v38 = vld [vmem:[%s3428_s3 + $0x120] ss:$16 sps:$4 sm:$0xff]   ;;  %v2508_v39 = vld [vmem:[%s3428_s3 + $0x128] ss:$16 sps:$4 sm:$0xff]   ;;  %v2746_v12 = vmov 0  }
  0x14   : > { %958 = vmatpush1.bf16.msra.mxu0 %v2471_v14  ;;  %1044 = vmatpush1.bf16.msra.mxu1 %v2472_v15  ;;  %v2509_v40 = vld [vmem:[%s3428_s3 + $0x144] ss:$16 sps:$4 sm:$0xff]   ;;  %v2511_v41 = vld [vmem:[%s3428_s3 + $0x14c] ss:$16 sps:$4 sm:$0xff]   ;;  %s2423_s13 = smul.u32 48, %s3438_s24  ;;  %vm947_vm0 = vcmask 523264  }
  0x15   : > { %959 = vmatprep.subr.bf16.mxu0 %v2473_v16  ;;  %1045 = vmatprep.subr.bf16.mxu1 %v2475_v17  ;;  %v2513_v42 = vld [vmem:[%s3428_s3 + $0x140] ss:$16 sps:$4 sm:$0xff]   ;;  %v2514_v43 = vld [vmem:[%s3428_s3 + $0x148] ss:$16 sps:$4 sm:$0xff]   ;;  %v2515_v44 = vld [vmem:[%s3428_s3 + $0x164] ss:$16 sps:$4 sm:$0xff]  }
  0x16   : > { %v2517_v45 = vld [vmem:[%s3428_s3 + $0x16c] ss:$16 sps:$4 sm:$0xff]   ;;  %s2955_s28 = scalar_lea.vmem %s3426_s1, %s2423_s13  ;;  %v2519_v46 = vld [vmem:[%s3428_s3 + $0x160] ss:$16 sps:$4 sm:$0xff]   ;;  %v2520_v47 = vld [vmem:[%s3428_s3 + $0x168] ss:$16 sps:$4 sm:$0xff]   ;;  %s3134_s15 = scalar_lea.vmem %s3425_s0, %s2423_s13 }
  0x17   : > { %v2521_v48 = vld [vmem:[%s3428_s3 + $0x184] ss:$16 sps:$4 sm:$0xff]   ;;  %v2547_v49 = vld [vmem:[%s2955_s28 + $0x1c] ss:$12 sps:$4 sm:$0xff]   ;;  %v2525_v51 = vld [vmem:[%s3428_s3 + $0x180] ss:$16 sps:$4 sm:$0xff]  }
  0x18   : > { %960 = vmatpush1.bf16.msra.mxu0 %v2477_v18  ;;  %1046 = vmatpush1.bf16.msra.mxu1 %v2478_v19  ;;  %v2523_v50 = vld [vmem:[%s3428_s3 + $0x18c] ss:$16 sps:$4 sm:$0xff]   ;;  %v2526_v52 = vld [vmem:[%s3428_s3 + $0x188] ss:$16 sps:$4 sm:$0xff]   ;;  %v2527_v53 = vld [vmem:[%s3428_s3 + $0x1a4] ss:$16 sps:$4 sm:$0xff]  }
  0x19   : > { %961 = vmatprep.subr.bf16.mxu0 %v2479_v20  ;;  %1047 = vmatprep.subr.bf16.mxu1 %v2481_v21  ;;  %v2529_v54 = vld [vmem:[%s3428_s3 + $0x1ac] ss:$16 sps:$4 sm:$0xff]   ;;  %v2531_v55 = vld [vmem:[%s3428_s3 + $0x1a0] ss:$16 sps:$4 sm:$0xff]   ;;  %v2532_v56 = vld [vmem:[%s3428_s3 + $0x1a8] ss:$16 sps:$4 sm:$0xff]  }
  0x1a   : > { %983 = vmatprep.mubr.bf16.mxu0 %v2547_v49  ;;  %1069 = vmatprep.mubr.bf16.mxu1 %v2547_v49  ;;  %v2533_v57 = vld [vmem:[%s3428_s3 + $0x1c4] ss:$16 sps:$4 sm:$0xff]   ;;  %v2535_v58 = vld [vmem:[%s3428_s3 + $0x1cc] ss:$16 sps:$4 sm:$0xff]   ;;  %v2537_v59 = vld [vmem:[%s3428_s3 + $0x1c0] ss:$16 sps:$4 sm:$0xff]  }
  0x1b   : > { %v2538_v60 = vld [vmem:[%s3428_s3 + $0x1c8] ss:$16 sps:$4 sm:$0xff]   ;;  %v2539_v61 = vld [vmem:[%s3428_s3 + $0x1e4] ss:$16 sps:$4 sm:$0xff]   ;;  %v2541_v62 = vld [vmem:[%s3428_s3 + $0x1ec] ss:$16 sps:$4 sm:$0xff]  }
  0x1c   : > { %962 = vmatpush1.bf16.msra.mxu0 %v2483_v22  ;;  %1048 = vmatpush1.bf16.msra.mxu1 %v2484_v23  ;;  %v2543_v63 = vld [vmem:[%s3428_s3 + $0x1e0] ss:$16 sps:$4 sm:$0xff]   ;;  %v2544_v0 = vld [vmem:[%s3428_s3 + $0x1e8] ss:$16 sps:$4 sm:$0xff]   ;;  %v2551_v1 = vld [vmem:[%s3428_s3 + $0x204] ss:$16 sps:$4 sm:$0xff]  }
  0x1d   : > { %963 = vmatprep.subr.bf16.mxu0 %v2485_v24  ;;  %1049 = vmatprep.subr.bf16.mxu1 %v2487_v25  ;;  %v2554_v2 = vld [vmem:[%s3428_s3 + $0x20c] ss:$16 sps:$4 sm:$0xff]   ;;  %v2545_v3 = vld [vmem:[%s2955_s28 + $0x18] ss:$12 sps:$4 sm:$0xff]   ;;  %v2549_v4 = vld [vmem:[%s3428_s3 + $0x200] ss:$16 sps:$4 sm:$0xff]  }
  0x1e   : > { %v2552_v5 = vld [vmem:[%s3428_s3 + $0x208] ss:$16 sps:$4 sm:$0xff]   ;;  %v2557_v6 = vld [vmem:[%s3428_s3 + $0x224] ss:$16 sps:$4 sm:$0xff]   ;;  %v2560_v7 = vld [vmem:[%s3428_s3 + $0x22c] ss:$16 sps:$4 sm:$0xff]  }
  0x1f   : > { %v2555_v8 = vld [vmem:[%s3428_s3 + $0x220] ss:$16 sps:$4 sm:$0xff]   ;;  %v2558_v9 = vld [vmem:[%s3428_s3 + $0x228] ss:$16 sps:$4 sm:$0xff]   ;;  %v2563_v10 = vld [vmem:[%s3428_s3 + $0x244] ss:$16 sps:$4 sm:$0xff]  }
  0x20   : > { %964 = vmatpush1.bf16.msra.mxu0 %v2489_v26  ;;  %1050 = vmatpush1.bf16.msra.mxu1 %v2490_v27  ;;  %v2566_v11 = vld [vmem:[%s3428_s3 + $0x24c] ss:$16 sps:$4 sm:$0xff]   ;;  %v2561_v13 = vld [vmem:[%s3428_s3 + $0x240] ss:$16 sps:$4 sm:$0xff]   ;;  %v2564_v14 = vld [vmem:[%s3428_s3 + $0x248] ss:$16 sps:$4 sm:$0xff]  }
  0x21   : > { %965 = vmatprep.subr.bf16.mxu0 %v2491_v28  ;;  %1051 = vmatprep.subr.bf16.mxu1 %v2493_v29  ;;  %v2569_v15 = vld [vmem:[%s3428_s3 + $0x264] ss:$16 sps:$4 sm:$0xff]   ;;  %v2572_v16 = vld [vmem:[%s3428_s3 + $0x26c] ss:$16 sps:$4 sm:$0xff]   ;;  %v2567_v17 = vld [vmem:[%s3428_s3 + $0x260] ss:$16 sps:$4 sm:$0xff]  }
  0x22   : > { %v2570_v18 = vld [vmem:[%s3428_s3 + $0x268] ss:$16 sps:$4 sm:$0xff]   ;;  %v2575_v19 = vld [vmem:[%s3427_s2 + $0x4] ss:$16 sps:$4 sm:$0xff]   ;;  %v2578_v20 = vld [vmem:[%s3427_s2 + $0xc] ss:$16 sps:$4 sm:$0xff]  }
  0x23   : > { %v2548_v21 = vld [vmem:[%s2955_s28 + $0x20] ss:$12 sps:$4 sm:$0xff]   ;;  %v2576_v23 = vld [vmem:[%s3427_s2 + $0x8] ss:$16 sps:$4 sm:$0xff]   ;;  %v2581_v24 = vld [vmem:[%s3427_s2 + $0x24] ss:$16 sps:$4 sm:$0xff]  }
  0x24   : > { %966 = vmatpush1.bf16.msra.mxu0 %v2495_v30  ;;  %1052 = vmatpush1.bf16.msra.mxu1 %v2496_v31  ;;  %v2573_v22 = vld [vmem:[%s3427_s2] ss:$16 sps:$4 sm:$0xff]   ;;  %v2584_v25 = vld [vmem:[%s3427_s2 + $0x2c] ss:$16 sps:$4 sm:$0xff]   ;;  %v2582_v27 = vld [vmem:[%s3427_s2 + $0x28] ss:$16 sps:$4 sm:$0xff]  }
  0x25   : > { %967 = vmatprep.subr.bf16.mxu0 %v2497_v32  ;;  %1053 = vmatprep.subr.bf16.mxu1 %v2499_v33  ;;  %v2579_v26 = vld [vmem:[%s3427_s2 + $0x20] ss:$16 sps:$4 sm:$0xff]   ;;  %v2587_v28 = vld [vmem:[%s3427_s2 + $0x44] ss:$16 sps:$4 sm:$0xff]   ;;  %v2590_v29 = vld [vmem:[%s3427_s2 + $0x4c] ss:$16 sps:$4 sm:$0xff]  }
  0x26   : > { %v2585_v30 = vld [vmem:[%s3427_s2 + $0x40] ss:$16 sps:$4 sm:$0xff]   ;;  %v2588_v31 = vld [vmem:[%s3427_s2 + $0x48] ss:$16 sps:$4 sm:$0xff]   ;;  %v2593_v32 = vld [vmem:[%s3427_s2 + $0x64] ss:$16 sps:$4 sm:$0xff]  }
  0x27   : > { %v2596_v33 = vld [vmem:[%s3427_s2 + $0x6c] ss:$16 sps:$4 sm:$0xff]   ;;  %v2617_v49 = vld [vmem:[%s3427_s2 + $0xe4] ss:$16 sps:$4 sm:$0xff]   ;;  %vm1962_vm1 = vcmask 130048   ;;  %s2376_s21 = sshll.u32 %s3438_s24, 4 }
  0x28   : > { %968 = vmatpush1.bf16.msra.mxu0 %v2501_v34  ;;  %1054 = vmatpush1.bf16.msra.mxu1 %v2502_v35  ;;  %v2591_v34 = vld [vmem:[%s3427_s2 + $0x60] ss:$16 sps:$4 sm:$0xff]   ;;  %v2594_v35 = vld [vmem:[%s3427_s2 + $0x68] ss:$16 sps:$4 sm:$0xff]   ;;  %s361_s29 = scalar_lea.vmem %s3432_s7, %s2376_s21 }
  0x29   : > { %969 = vmatprep.subr.bf16.mxu0 %v2503_v36  ;;  %1055 = vmatprep.subr.bf16.mxu1 %v2505_v37  ;;  %v2599_v36 = vld [vmem:[%s3427_s2 + $0x84] ss:$16 sps:$4 sm:$0xff]   ;;  %v2602_v37 = vld [vmem:[%s3427_s2 + $0x8c] ss:$16 sps:$4 sm:$0xff]  }
  0x2c   : > { %970 = vmatpush1.bf16.msra.mxu0 %v2507_v38  ;;  %1056 = vmatpush1.bf16.msra.mxu1 %v2508_v39  ;;  %v2597_v38 = vld [vmem:[%s3427_s2 + $0x80] ss:$16 sps:$4 sm:$0xff]   ;;  %v2600_v39 = vld [vmem:[%s3427_s2 + $0x88] ss:$16 sps:$4 sm:$0xff]  }
  0x2d   : > { %971 = vmatprep.subr.bf16.mxu0 %v2509_v40  ;;  %1057 = vmatprep.subr.bf16.mxu1 %v2511_v41  ;;  %v2605_v40 = vld [vmem:[%s3427_s2 + $0xa4] ss:$16 sps:$4 sm:$0xff]   ;;  %v2608_v41 = vld [vmem:[%s3427_s2 + $0xac] ss:$16 sps:$4 sm:$0xff]  }
  0x30   : > { %972 = vmatpush1.bf16.msra.mxu0 %v2513_v42  ;;  %1058 = vmatpush1.bf16.msra.mxu1 %v2514_v43  ;;  %v2603_v42 = vld [vmem:[%s3427_s2 + $0xa0] ss:$16 sps:$4 sm:$0xff]  }
  0x31   : > { %973 = vmatprep.subr.bf16.mxu0 %v2515_v44  ;;  %1059 = vmatprep.subr.bf16.mxu1 %v2517_v45  ;;  %v2671_v43 = vld [vmem:[%s3134_s15 + $0x4] ss:$12 sps:$4 sm:$0xff]   ;;  %v2606_v44 = vld [vmem:[%s3427_s2 + $0xa8] ss:$16 sps:$4 sm:$0xff]  }
  0x32   : > { %v2611_v45 = vld [vmem:[%s3427_s2 + $0xc4] ss:$16 sps:$4 sm:$0xff]  }
  0x34   : > { %974 = vmatpush1.bf16.msra.mxu0 %v2519_v46  ;;  %1060 = vmatpush1.bf16.msra.mxu1 %v2520_v47  ;;  %v2614_v46 = vld [vmem:[%s3427_s2 + $0xcc] ss:$16 sps:$4 sm:$0xff]   ;;  %v2609_v47 = vld [vmem:[%s3427_s2 + $0xc0] ss:$16 sps:$4 sm:$0xff]  }
  0x35   : > { %975 = vmatprep.subr.bf16.mxu0 %v2521_v48  ;;  %1061 = vmatprep.subr.bf16.mxu1 %v2523_v50  ;;  %v2612_v48 = vld [vmem:[%s3427_s2 + $0xc8] ss:$16 sps:$4 sm:$0xff]   ;;  %v2620_v50 = vld [vmem:[%s3427_s2 + $0xec] ss:$16 sps:$4 sm:$0xff]  }
  0x38   : > { %976 = vmatpush1.bf16.msra.mxu0 %v2525_v51  ;;  %1062 = vmatpush1.bf16.msra.mxu1 %v2526_v52  ;;  %v2615_v51 = vld [vmem:[%s3427_s2 + $0xe0] ss:$16 sps:$4 sm:$0xff]   ;;  %v2618_v52 = vld [vmem:[%s3427_s2 + $0xe8] ss:$16 sps:$4 sm:$0xff]  }
  0x39   : > { %977 = vmatprep.subr.bf16.mxu0 %v2527_v53  ;;  %1063 = vmatprep.subr.bf16.mxu1 %v2529_v54  ;;  %v2623_v53 = vld [vmem:[%s3427_s2 + $0x104] ss:$16 sps:$4 sm:$0xff]   ;;  %v2626_v54 = vld [vmem:[%s3427_s2 + $0x10c] ss:$16 sps:$4 sm:$0xff]  }
  0x3c   : > { %978 = vmatpush1.bf16.msra.mxu0 %v2531_v55  ;;  %1064 = vmatpush1.bf16.msra.mxu1 %v2532_v56  ;;  %v2621_v55 = vld [vmem:[%s3427_s2 + $0x100] ss:$16 sps:$4 sm:$0xff]   ;;  %v2624_v56 = vld [vmem:[%s3427_s2 + $0x108] ss:$16 sps:$4 sm:$0xff]  }
  0x3d   : > { %979 = vmatprep.subr.bf16.mxu0 %v2533_v57  ;;  %1065 = vmatprep.subr.bf16.mxu1 %v2535_v58  ;;  %v2629_v57 = vld [vmem:[%s3427_s2 + $0x124] ss:$16 sps:$4 sm:$0xff]   ;;  %v2632_v58 = vld [vmem:[%s3427_s2 + $0x12c] ss:$16 sps:$4 sm:$0xff]  }
  0x40   : > { %980 = vmatpush1.bf16.msra.mxu0 %v2537_v59  ;;  %1066 = vmatpush1.bf16.msra.mxu1 %v2538_v60  ;;  %v2627_v59 = vld [vmem:[%s3427_s2 + $0x120] ss:$16 sps:$4 sm:$0xff]   ;;  %v2630_v60 = vld [vmem:[%s3427_s2 + $0x128] ss:$16 sps:$4 sm:$0xff]  }
  0x41   : > { %981 = vmatprep.subr.bf16.mxu0 %v2539_v61  ;;  %1067 = vmatprep.subr.bf16.mxu1 %v2541_v62  ;;  %v2635_v61 = vld [vmem:[%s3427_s2 + $0x144] ss:$16 sps:$4 sm:$0xff]   ;;  %v2638_v62 = vld [vmem:[%s3427_s2 + $0x14c] ss:$16 sps:$4 sm:$0xff]  }
  0x44   : > { %982 = vmatpush1.bf16.msra.mxu0 %v2543_v63  ;;  %1068 = vmatpush1.bf16.msra.mxu1 %v2544_v0  ;;  %v2633_v63 = vld [vmem:[%s3427_s2 + $0x140] ss:$16 sps:$4 sm:$0xff]   ;;  %v2636_v0 = vld [vmem:[%s3427_s2 + $0x148] ss:$16 sps:$4 sm:$0xff]  }
  0x45   : > { %994 = vmatprep.subr.bf16.mxu0 %v2551_v1  ;;  %1080 = vmatprep.subr.bf16.mxu1 %v2554_v2  ;;  %v2641_v1 = vld [vmem:[%s3427_s2 + $0x164] ss:$16 sps:$4 sm:$0xff]   ;;  %v2644_v2 = vld [vmem:[%s3427_s2 + $0x16c] ss:$16 sps:$4 sm:$0xff]  }
  0x47   : > { %984 = vmatmul.mubr.bf16.vlgmr.msra.gmra.mrb[0].mxu0 %v2545_v3  ;;  %1070 = vmatmul.mubr.bf16.vlgmr.msra.gmra.mrb[0].mxu1 %v2545_v3  ;;  %v2639_v3 = vld [vmem:[%s3427_s2 + $0x160] ss:$16 sps:$4 sm:$0xff]  }
  0x48   : > { %995 = vmatpush1.bf16.msra.mxu0 %v2549_v4  ;;  %1081 = vmatpush1.bf16.msra.mxu1 %v2552_v5  ;;  %v2642_v4 = vld [vmem:[%s3427_s2 + $0x168] ss:$16 sps:$4 sm:$0xff]   ;;  %v2647_v5 = vld [vmem:[%s3427_s2 + $0x184] ss:$16 sps:$4 sm:$0xff]  }
  0x49   : > { %996 = vmatprep.subr.bf16.mxu0 %v2557_v6  ;;  %1082 = vmatprep.subr.bf16.mxu1 %v2560_v7  ;;  %v2650_v6 = vld [vmem:[%s3427_s2 + $0x18c] ss:$16 sps:$4 sm:$0xff]   ;;  %v2645_v7 = vld [vmem:[%s3427_s2 + $0x180] ss:$16 sps:$4 sm:$0xff]  }
  0x4a   : > { %1026 = vmatprep.mubr.bf16.mxu0 %v2746_v12  ;;  %1112 = vmatprep.mubr.bf16.mxu1 %v2746_v12 }
  0x4c   : > { %997 = vmatpush1.bf16.msra.mxu0 %v2555_v8  ;;  %1083 = vmatpush1.bf16.msra.mxu1 %v2558_v9  ;;  %v2648_v8 = vld [vmem:[%s3427_s2 + $0x188] ss:$16 sps:$4 sm:$0xff]   ;;  %v2653_v9 = vld [vmem:[%s3427_s2 + $0x1a4] ss:$16 sps:$4 sm:$0xff]  }
  0x4d   : > { %998 = vmatprep.subr.bf16.mxu0 %v2563_v10  ;;  %1084 = vmatprep.subr.bf16.mxu1 %v2566_v11  ;;  %v2656_v10 = vld [vmem:[%s3427_s2 + $0x1ac] ss:$16 sps:$4 sm:$0xff]   ;;  %v2651_v11 = vld [vmem:[%s3427_s2 + $0x1a0] ss:$16 sps:$4 sm:$0xff]  }
  0x50   : > { %999 = vmatpush1.bf16.msra.mxu0 %v2561_v13  ;;  %1085 = vmatpush1.bf16.msra.mxu1 %v2564_v14  ;;  %v2654_v13 = vld [vmem:[%s3427_s2 + $0x1a8] ss:$16 sps:$4 sm:$0xff]   ;;  %v2659_v14 = vld [vmem:[%s3427_s2 + $0x1c4] ss:$16 sps:$4 sm:$0xff]  }
  0x51   : > { %1000 = vmatprep.subr.bf16.mxu0 %v2569_v15  ;;  %1086 = vmatprep.subr.bf16.mxu1 %v2572_v16  ;;  %v2662_v15 = vld [vmem:[%s3427_s2 + $0x1cc] ss:$16 sps:$4 sm:$0xff]   ;;  %v2657_v16 = vld [vmem:[%s3427_s2 + $0x1c0] ss:$16 sps:$4 sm:$0xff]  }
  0x54   : > { %1001 = vmatpush1.bf16.msra.mxu0 %v2567_v17  ;;  %1087 = vmatpush1.bf16.msra.mxu1 %v2570_v18  ;;  %v2660_v17 = vld [vmem:[%s3427_s2 + $0x1c8] ss:$16 sps:$4 sm:$0xff]   ;;  %v2665_v18 = vld [vmem:[%s3427_s2 + $0x1e4] ss:$16 sps:$4 sm:$0xff]  }
  0x55   : > { %1541 = vmatprep.subr.bf16.mxu0 %v2575_v19  ;;  %1627 = vmatprep.subr.bf16.mxu1 %v2578_v20  ;;  %v2668_v19 = vld [vmem:[%s3427_s2 + $0x1ec] ss:$16 sps:$4 sm:$0xff]   ;;  %v2663_v20 = vld [vmem:[%s3427_s2 + $0x1e0] ss:$16 sps:$4 sm:$0xff]  }
  0x57   : > { %2260 = vmatmul.mubr.msk.bf16.vlgmr.msra.gmra.mrb[0].mxu0 %vm947_vm0, %v2548_v21  ;;  %2261 = vmatmul.mubr.msk.bf16.vlgmr.msra.gmra.mrb[0].mxu1 %vm947_vm0, %v2548_v21  ;;  %v2666_v21 = vld [vmem:[%s3427_s2 + $0x1e8] ss:$16 sps:$4 sm:$0xff]  }
  0x58   : > { %1542 = vmatpush1.bf16.msra.mxu0 %v2573_v22  ;;  %1628 = vmatpush1.bf16.msra.mxu1 %v2576_v23  ;;  %v2674_v22 = vld [vmem:[%s3427_s2 + $0x204] ss:$16 sps:$4 sm:$0xff]   ;;  %v2677_v23 = vld [vmem:[%s3427_s2 + $0x20c] ss:$16 sps:$4 sm:$0xff]  }
  0x59   : > { %1543 = vmatprep.subr.bf16.mxu0 %v2581_v24  ;;  %1629 = vmatprep.subr.bf16.mxu1 %v2584_v25  ;;  %v2669_v24 = vld [vmem:[%s3134_s15] ss:$12 sps:$4 sm:$0xff]  }
  0x5a   : > { %1573 = vmatprep.mubr.bf16.mxu0 %v2671_v43  ;;  %1659 = vmatprep.mubr.bf16.mxu1 %v2671_v43  ;;  %v2672_v25 = vld [vmem:[%s3427_s2 + $0x200] ss:$16 sps:$4 sm:$0xff]   ;;  %v2701_v43 = vld [vmem:[%s3430_s5 + $0x48] sm:$0xff]  }
  0x5c   : > { %1544 = vmatpush1.bf16.msra.mxu0 %v2579_v26  ;;  %1630 = vmatpush1.bf16.msra.mxu1 %v2582_v27  ;;  %v2675_v26 = vld [vmem:[%s3427_s2 + $0x208] ss:$16 sps:$4 sm:$0xff]   ;;  %v2680_v27 = vld [vmem:[%s3427_s2 + $0x224] ss:$16 sps:$4 sm:$0xff]  }
  0x5d   : > { %1545 = vmatprep.subr.bf16.mxu0 %v2587_v28  ;;  %1631 = vmatprep.subr.bf16.mxu1 %v2590_v29  ;;  %v2683_v28 = vld [vmem:[%s3427_s2 + $0x22c] ss:$16 sps:$4 sm:$0xff]   ;;  %v2678_v29 = vld [vmem:[%s3427_s2 + $0x220] ss:$16 sps:$4 sm:$0xff]  }
  0x60   : > { %1546 = vmatpush1.bf16.msra.mxu0 %v2585_v30  ;;  %1632 = vmatpush1.bf16.msra.mxu1 %v2588_v31  ;;  %v2681_v30 = vld [vmem:[%s3427_s2 + $0x228] ss:$16 sps:$4 sm:$0xff]   ;;  %v2686_v31 = vld [vmem:[%s3427_s2 + $0x244] ss:$16 sps:$4 sm:$0xff]  }
  0x61   : > { %1547 = vmatprep.subr.bf16.mxu0 %v2593_v32  ;;  %1633 = vmatprep.subr.bf16.mxu1 %v2596_v33  ;;  %v2689_v32 = vld [vmem:[%s3427_s2 + $0x24c] ss:$16 sps:$4 sm:$0xff]   ;;  %v2684_v33 = vld [vmem:[%s3427_s2 + $0x240] ss:$16 sps:$4 sm:$0xff]  }
  0x64   : > { %1548 = vmatpush1.bf16.msra.mxu0 %v2591_v34  ;;  %1634 = vmatpush1.bf16.msra.mxu1 %v2594_v35  ;;  %v2687_v34 = vld [vmem:[%s3427_s2 + $0x248] ss:$16 sps:$4 sm:$0xff]   ;;  %v2692_v35 = vld [vmem:[%s3427_s2 + $0x264] ss:$16 sps:$4 sm:$0xff]  }
  0x65   : > { %1549 = vmatprep.subr.bf16.mxu0 %v2599_v36  ;;  %1635 = vmatprep.subr.bf16.mxu1 %v2602_v37  ;;  %v2695_v36 = vld [vmem:[%s3427_s2 + $0x26c] ss:$16 sps:$4 sm:$0xff]   ;;  %v2690_v37 = vld [vmem:[%s3427_s2 + $0x260] ss:$16 sps:$4 sm:$0xff]  }
  0x68   : > { %1550 = vmatpush1.bf16.msra.mxu0 %v2597_v38  ;;  %1636 = vmatpush1.bf16.msra.mxu1 %v2600_v39  ;;  %v2693_v38 = vld [vmem:[%s3427_s2 + $0x268] ss:$16 sps:$4 sm:$0xff]   ;;  %v2698_v39 = vld [vmem:[%s3430_s5 + $0x40] sm:$0xff]  }
  0x69   : > { %1551 = vmatprep.subr.bf16.mxu0 %v2605_v40  ;;  %1637 = vmatprep.subr.bf16.mxu1 %v2608_v41  ;;  %v2696_v40 = vld [vmem:[%s3134_s15 + $0x8] ss:$12 sps:$4 sm:$0xff]   ;;  %v2697_v41 = vld [vmem:[%s3430_s5 + $0x80] sm:$0xff]  }
  0x6c   : > { %1552 = vmatpush1.bf16.msra.mxu0 %v2603_v42  ;;  %1638 = vmatpush1.bf16.msra.mxu1 %v2606_v44  ;;  %v2699_v42 = vld [vmem:[%s3430_s5] sm:$0xff]   ;;  %v2700_v44 = vld [vmem:[%s3430_s5 + $0x88] sm:$0xff]  }
  0x6d   : > { %1553 = vmatprep.subr.bf16.mxu0 %v2611_v45  ;;  %1639 = vmatprep.subr.bf16.mxu1 %v2614_v46  ;;  %v2702_v45 = vld [vmem:[%s3430_s5 + $0x8] sm:$0xff]   ;;  %v2704_v46 = vld [vmem:[%s3430_s5 + $0x50] sm:$0xff]  }
  0x70   : > { %1554 = vmatpush1.bf16.msra.mxu0 %v2609_v47  ;;  %1640 = vmatpush1.bf16.msra.mxu1 %v2612_v48  ;;  %v2703_v47 = vld [vmem:[%s3430_s5 + $0x90] sm:$0xff]  }
  0x71   : > { %1555 = vmatprep.subr.bf16.mxu0 %v2617_v49  ;;  %1641 = vmatprep.subr.bf16.mxu1 %v2620_v50  ;;  %v2705_v48 = vld [vmem:[%s3430_s5 + $0x10] sm:$0xff]   ;;  %v2707_v49 = vld [vmem:[%s3430_s5 + $0x58] sm:$0xff]  }
  0x72   : > { %v2706_v50 = vld [vmem:[%s3430_s5 + $0x98] sm:$0xff]  }
  0x74   : > { %1556 = vmatpush1.bf16.msra.mxu0 %v2615_v51  ;;  %1642 = vmatpush1.bf16.msra.mxu1 %v2618_v52  ;;  %v2708_v51 = vld [vmem:[%s3430_s5 + $0x18] sm:$0xff]   ;;  %v2710_v52 = vld [vmem:[%s3430_s5 + $0x60] sm:$0xff]  }
  0x75   : > { %1557 = vmatprep.subr.bf16.mxu0 %v2623_v53  ;;  %1643 = vmatprep.subr.bf16.mxu1 %v2626_v54  ;;  %v2709_v53 = vld [vmem:[%s3430_s5 + $0xa0] sm:$0xff]  }
  0x76   : > { %v2711_v54 = vld [vmem:[%s3430_s5 + $0x20] sm:$0xff]  }
  0x78   : > { %1558 = vmatpush1.bf16.msra.mxu0 %v2621_v55  ;;  %1644 = vmatpush1.bf16.msra.mxu1 %v2624_v56  ;;  %v2713_v55 = vld [vmem:[%s3430_s5 + $0x68] sm:$0xff]  }
  0x79   : > { %1559 = vmatprep.subr.bf16.mxu0 %v2629_v57  ;;  %1645 = vmatprep.subr.bf16.mxu1 %v2632_v58  ;;  %v2712_v56 = vld [vmem:[%s3430_s5 + $0xa8] sm:$0xff]   ;;  %v2715_v58 = vld [vmem:[%s3430_s5 + $0xb0] sm:$0xff]  }
  0x7a   : > { %v2714_v57 = vld [vmem:[%s3430_s5 + $0x28] sm:$0xff]  }
  0x7c   : > { %1560 = vmatpush1.bf16.msra.mxu0 %v2627_v59  ;;  %1646 = vmatpush1.bf16.msra.mxu1 %v2630_v60  ;;  %v2716_v59 = vld [vmem:[%s3430_s5 + $0x70] sm:$0xff]  }
  0x7d   : > { %1561 = vmatprep.subr.bf16.mxu0 %v2635_v61  ;;  %1647 = vmatprep.subr.bf16.mxu1 %v2638_v62  ;;  %v2717_v60 = vld [vmem:[%s3430_s5 + $0x30] sm:$0xff]   ;;  %v2718_v61 = vld [vmem:[%s3430_s5 + $0xb8] sm:$0xff]  }
  0x7e   : > { %v2719_v62 = vld [vmem:[%s3430_s5 + $0x78] sm:$0xff]  }
  0x80   : > { %1562 = vmatpush1.bf16.msra.mxu0 %v2633_v63  ;;  %1648 = vmatpush1.bf16.msra.mxu1 %v2636_v0  ;;  %v2720_v63 = vld [vmem:[%s3430_s5 + $0x38] sm:$0xff]   ;;  %v2721_v0 = vld [vmem:[%s3430_s5 + $0xc0] sm:$0xff]  }
  0x81   : > { %1563 = vmatprep.subr.bf16.mxu0 %v2641_v1  ;;  %1649 = vmatprep.subr.bf16.mxu1 %v2644_v2  ;;  %v1715_v1 = vlaneseq }
  0x83   : > { %v1716_v2 = vshrl.u32 %v1715_v1, 7 }
  0x84   : > { %1564 = vmatpush1.bf16.msra.mxu0 %v2639_v3  ;;  %1650 = vmatpush1.bf16.msra.mxu1 %v2642_v4 }
  0x85   : > { %1565 = vmatprep.subr.bf16.mxu0 %v2647_v5  ;;  %1651 = vmatprep.subr.bf16.mxu1 %v2650_v6  ;;  %v1717_v3 = vsub.s32 0, %v1716_v2  ;;  %v1725_v4 = vsub.s32 2, %v1716_v2  ;;  %v1713_v5 = vld [vmem:[%s3429_s4] sm:$0xf]  ;;  %v1729_v6 = vsub.s32 3, %v1716_v2 }
  0x88   : > { %1566 = vmatpush1.bf16.msra.mxu0 %v2645_v7  ;;  %1652 = vmatpush1.bf16.msra.mxu1 %v2648_v8  ;;  %v1718_v7 = vrot.slane %v1713_v5, %v1717_v3  ;;  %v1726_v8 = vrot.slane %v1713_v5, %v1725_v4 }
  0x89   : > { %1567 = vmatprep.subr.bf16.mxu0 %v2653_v9  ;;  %1653 = vmatprep.subr.bf16.mxu1 %v2656_v10  ;;  %v1730_v10 = vrot.slane %v1713_v5, %v1729_v6 }
  0x8c   : > { %1568 = vmatpush1.bf16.msra.mxu0 %v2651_v11  ;;  %1654 = vmatpush1.bf16.msra.mxu1 %v2654_v13 }
  0x8d   : > { %1569 = vmatprep.subr.bf16.mxu0 %v2659_v14  ;;  %1655 = vmatprep.subr.bf16.mxu1 %v2662_v15 }
  0x90   : > { %1570 = vmatpush1.bf16.msra.mxu0 %v2657_v16  ;;  %1656 = vmatpush1.bf16.msra.mxu1 %v2660_v17 }
  0x91   : > { %1571 = vmatprep.subr.bf16.mxu0 %v2665_v18  ;;  %1657 = vmatprep.subr.bf16.mxu1 %v2668_v19 }
  0x94   : > { %1572 = vmatpush1.bf16.msra.mxu0 %v2663_v20  ;;  %1658 = vmatpush1.bf16.msra.mxu1 %v2666_v21 }
  0x95   : > { %1584 = vmatprep.subr.bf16.mxu0 %v2674_v22  ;;  %1670 = vmatprep.subr.bf16.mxu1 %v2677_v23 }
  0x97   : > { %1574 = vmatmul.mubr.bf16.vlgmr.msra.gmra.mrb[0].mxu0 %v2669_v24  ;;  %1660 = vmatmul.mubr.bf16.vlgmr.msra.gmra.mrb[0].mxu1 %v2669_v24 }
  0x98   : > { %1585 = vmatpush1.bf16.msra.mxu0 %v2672_v25  ;;  %1671 = vmatpush1.bf16.msra.mxu1 %v2675_v26 }
  0x99   : > { %1586 = vmatprep.subr.bf16.mxu0 %v2680_v27  ;;  %1672 = vmatprep.subr.bf16.mxu1 %v2683_v28 }
  0x9a   : > { %1616 = vmatprep.mubr.bf16.mxu0 %v2746_v12  ;;  %1702 = vmatprep.mubr.bf16.mxu1 %v2746_v12 }
  0x9c   : > { %1587 = vmatpush1.bf16.msra.mxu0 %v2678_v29  ;;  %1673 = vmatpush1.bf16.msra.mxu1 %v2681_v30 }
  0x9d   : > { %1588 = vmatprep.subr.bf16.mxu0 %v2686_v31  ;;  %1674 = vmatprep.subr.bf16.mxu1 %v2689_v32 }
  0xa0   : > { %1589 = vmatpush1.bf16.msra.mxu0 %v2684_v33  ;;  %1675 = vmatpush1.bf16.msra.mxu1 %v2687_v34 }
  0xa1   : > { %1590 = vmatprep.subr.bf16.mxu0 %v2692_v35  ;;  %1676 = vmatprep.subr.bf16.mxu1 %v2695_v36 }
  0xa4   : > { %1591 = vmatpush1.bf16.msra.mxu0 %v2690_v37  ;;  %1677 = vmatpush1.bf16.msra.mxu1 %v2693_v38 }
  0xa5   : > { %2007 = vmatprep.subr.bf16.mxu1 %v2746_v12  ;;  %2377 = vmatprep.subr.bf16.mxu0 %v2698_v39 }
  0xa7   : > { %2345 = vmatmul.mubr.msk.bf16.vlgmr.msra.gmra.mrb[0].mxu0 %vm947_vm0, %v2696_v40  ;;  %2346 = vmatmul.mubr.msk.bf16.vlgmr.msra.gmra.mrb[0].mxu1 %vm947_vm0, %v2696_v40 }
  0xa8   : > { %2008 = vmatpush1.bf16.msra.mxu1 %v2697_v41  ;;  %2378 = vmatpush3.bf16.msra.mxu0 %v2699_v42  ;;  %v2347_v42 = vld [vmem:[%s3431_s6] ss:$0 sm:$0xff] }
  0xa9   : > { %2009 = vmatprep.subr.bf16.mxu1 %v2746_v12  ;;  %2379 = vmatprep.subr.bf16.mxu0 %v2701_v43 }
  0xac   : > { %2010 = vmatpush1.bf16.msra.mxu1 %v2700_v44  ;;  %2380 = vmatpush3.bf16.msra.mxu0 %v2702_v45 }
  0xad   : > { %2011 = vmatprep.subr.bf16.mxu1 %v2746_v12  ;;  %2381 = vmatprep.subr.bf16.mxu0 %v2704_v46 }
  0xb0   : > { %2012 = vmatpush1.bf16.msra.mxu1 %v2703_v47  ;;  %2382 = vmatpush3.bf16.msra.mxu0 %v2705_v48 }
  0xb1   : > { %2013 = vmatprep.subr.bf16.mxu1 %v2746_v12  ;;  %2383 = vmatprep.subr.bf16.mxu0 %v2707_v49 }
  0xb4   : > { %2014 = vmatpush1.bf16.msra.mxu1 %v2706_v50  ;;  %2384 = vmatpush3.bf16.msra.mxu0 %v2708_v51 }
  0xb5   : > { %2015 = vmatprep.subr.bf16.mxu1 %v2746_v12  ;;  %2385 = vmatprep.subr.bf16.mxu0 %v2710_v52 }
  0xb8   : > { %2016 = vmatpush1.bf16.msra.mxu1 %v2709_v53  ;;  %2386 = vmatpush3.bf16.msra.mxu0 %v2711_v54 }
  0xb9   : > { %2017 = vmatprep.subr.bf16.mxu1 %v2746_v12  ;;  %2387 = vmatprep.subr.bf16.mxu0 %v2713_v55 }
  0xbc   : > { %2018 = vmatpush1.bf16.msra.mxu1 %v2712_v56  ;;  %2388 = vmatpush3.bf16.msra.mxu0 %v2714_v57 }
  0xbd   : > { %2019 = vmatprep.subr.bf16.mxu1 %v2746_v12  ;;  %2389 = vmatprep.subr.bf16.mxu0 %v2716_v59 }
  0xc0   : > { %2020 = vmatpush1.bf16.msra.mxu1 %v2715_v58  ;;  %2390 = vmatpush3.bf16.msra.mxu0 %v2717_v60 }
  0xc1   : > { %2021 = vmatprep.subr.bf16.mxu1 %v2746_v12  ;;  %2391 = vmatprep.subr.bf16.mxu0 %v2719_v62 }
  0xc4   : > { %2022 = vmatpush1.bf16.msra.mxu1 %v2718_v61  ;;  %2392 = vmatpush3.bf16.msra.mxu0 %v2720_v63 }
  0xc5   : > { %2023 = vmatprep.subr.bf16.mxu1 %v2746_v12  ;;  %v1721_v12 = vsub.s32 1, %v1716_v2 }
  0xc7   : > { %v1722_v9 = vrot.slane %v1713_v5, %v1721_v12 }
  0xc8   : > { %2024 = vmatpush1.bf16.msra.mxu1 %v2721_v0 }
 0x17a   : > { %v1618_v11 = vpop.f32.mrb[0].mxu0  ;;  %v1704_v13 = vpop.f32.mrb[0].mxu1 }
 0x17b   : > { %v1735_v14 = vadd.f32 %v1718_v7, %v1618_v11  ;;  %v1737_v15 = vadd.f32 %v1726_v8, %v1704_v13  ;;  %v1620_v16 = vpop.f32.mrb[1].mxu0  ;;  %v1706_v17 = vpop.f32.mrb[1].mxu1 }
 0x17c   : > { %v1736_v18 = vadd.f32 %v1722_v9, %v1620_v16  ;;  %v1738_v19 = vadd.f32 %v1730_v10, %v1706_v17  ;;  %v1622_v20 = vpop.f32.mrb[2].mxu0  ;;  %v1708_v21 = vpop.f32.mrb[2].mxu1 }
 0x17d   : > { %v1739_v22 = vadd.f32 %v1718_v7, %v1622_v20  ;;  %v1741_v23 = vadd.f32 %v1726_v8, %v1708_v21  ;;  %v1624_v24 = vpop.f32.mrb[3].mxu0  ;;  %v1710_v25 = vpop.f32.mrb[3].mxu1  ;;  %v1743_v28 = vmax.f32 %v1735_v14, 0.0  ;;  %v1745_v29 = vmax.f32 %v1737_v15, 0.0 }
 0x17e   : > { %v1740_v26 = vadd.f32 %v1722_v9, %v1624_v24  ;;  %v1742_v27 = vadd.f32 %v1730_v10, %v1710_v25  ;;  %v1744_v32 = vmax.f32 %v1736_v18, 0.0  ;;  %v1746_v33 = vmax.f32 %v1738_v19, 0.0 }
 0x17f   : > { %v1747_v30 = vmax.f32 %v1739_v22, 0.0  ;;  %v1749_v31 = vmax.f32 %v1741_v23, 0.0 }
 0x180   : > { %v1748_v34 = vmax.f32 %v1740_v26, 0.0  ;;  %v1750_v35 = vmax.f32 %v1742_v27, 0.0 }
 0x181   : > { %v1751_v36 = vpack.c.bf16 %v1747_v30, %v1743_v28  ;;  %v1753_v37 = vpack.c.bf16 %v1749_v31, %v1745_v29 }
 0x182   : > { %v1752_v38 = vpack.c.bf16 %v1748_v34, %v1744_v32  ;;  %v1754_v39 = vpack.c.bf16 %v1750_v35, %v1746_v33 }
 0x184   : > { %1998 = vmatprep.mubr.bf16.mxu0 %v1752_v38  ;;  %2373 = vmatprep.mubr.msk.bf16.mxu1 %vm1962_vm1, %v1754_v39 }
 0x185   : > { %1999 = vmatmul.mubr.bf16.vlgmr.msra.gmra.mrb[4].mxu0 %v1751_v36  ;;  %2040 = vmatmul.mubr.bf16.vlgmr.msra.gmra.mrb[4].mxu1 %v1753_v37 }
 0x258   : > { %v2393_v40 = vpop.f32.mrb[4].mxu0  ;;  %v2041_v41 = vpop.f32.mrb[4].mxu1 }
 0x259   : > { %v2394_v43 = vpop.f32.mrb[5].mxu0  ;;  %v2043_v44 = vpop.f32.mrb[5].mxu1 }
 0x25a   : > { %v2395_v45 = vadd.f32 %v2394_v43, %v2393_v40  ;;  %v2396_v46 = vpop.f32.mrb[6].mxu0  ;;  %v2044_v47 = vpop.f32.mrb[6].mxu1 }
 0x25b   : > { %v2397_v48 = vpop.f32.mrb[7].mxu0  ;;  %v2046_v49 = vpop.f32.mrb[7].mxu1 }
 0x25c   : > { %v2001_v50 = vadd.f32 %v2395_v45, %v2347_v42  ;;  %v2398_v51 = vadd.f32 %v2397_v48, %v2396_v46 }
 0x25e   : > { %v2042_v52 = vadd.f32 %v2041_v41, %v2001_v50  ;;  %v2004_v53 = vadd.f32 %v2398_v51, %v2347_v42 }
 0x260   : > { %2048 = vst.msk [vmem:[%s361_s29] sm:$0xff] %vm947_vm0, %v2042_v52  ;;  %v2045_v54 = vadd.f32 %v2044_v47, %v2004_v53 }
 0x262   : > { %2049 = vst.msk [vmem:[%s361_s29 + $0x8] sm:$0xff] %vm947_vm0, %v2045_v54 }
 0x263 PF: > { %s17_s26 = sadd.s32 1, %s2744_s26   ;;  %s3433_s24 = smov %s2740_s25 }
 0x264   : > { %p14_p5 = scmp.ge.s32.totalorder %s17_s26, 4   ;;  %s3434_s25 = smov %s3436_s27 }
 0x266   :  { %16 = sbr.rel (!%p14_p5) target bundleno = 2 (0x2), region = 81 }

// kernel: forward.8
= control target key start
LH: loop header
LB: loop body
LE: loop exit
PB: predicated region body
PF: predicated region fallthrough
CT: control target
= control target key end

     0   :  { %s947_s15 = smov 0   ;;  %s949_s16 = smov 0   ;;  %s1076_s0 = inlined_call_operand.vmem [shape: bf16[2,2,16,320], index: 0, kind: input, shape index: {}]   ;;  %s1077_s1 = inlined_call_operand.vmem [shape: bf16[320,128], index: 1, kind: input, shape index: {}]   ;;  %s1078_s2 = inlined_call_operand.vmem [shape: f32[1,128], index: 2, kind: input, shape index: {}]   ;;  %s1079_s3 = inlined_call_operand.vmem [shape: f32[2,16,64], index: 3, kind: input, shape index: {}]   ;;  %s1080_s4 = inlined_call_operand.vmem [shape: f32[2,2,16,128], index: 4, kind: output, shape index: {}]  }
   0x1   :  { %s951_s17 = smov 0   ;;  %s953_s18 = smov 0  }
   0x2   :  { %s955_s19 = smov 0  }
   0x3 LB: > { %s29_s20 = sadd.s32 1, %s909_s17  ;;  %s33_s21 = sadd.s32 1, %s913_s18  ;;  %s917_s19 = sphi %s955_s19, %s14_s19   ;;  %s913_s18 = sphi %s953_s18, %s1084_s18   ;;  %s909_s17 = sphi %s951_s17, %s1083_s17   ;;  %s905_s16 = sphi %s949_s16, %s1082_s16   ;;  %s901_s15 = sphi %s947_s15, %s1081_s15  }
   0x4   : > { %p31_p0 = scmp.ge.s32.totalorder %s29_s20, 2  ;;  %p736_p1 = scmp.ge.s32.totalorder %s917_s19, 1 }
   0x5   : > { %p216_p2 = scmp.lt.s32.totalorder %s917_s19, 5 }
   0x6   : > { %s1086_s20 = smov (%p31_p0, %s29_s20), 0  ;;  %s1088_s21 = smov (!%p31_p0, %s33_s21), %s913_s18 }
   0x7   : > { %p217_p3 = pnand %p736_p1, %p216_p2  ;;  %p35_p4 = scmp.ge.s32.totalorder %s1088_s21, 2 }
   0x8   : > { %v855_v0 = vld [vmem:[%s1077_s1 + $0x40] sm:$0xff] (!%p217_p3)   ;;  %v919_v2 = vmov (!%p217_p3), 0.0   ;;  %p269_p5 = scmp.lt.s32.totalorder (!%p217_p3), %s905_s16, 1  ;;  %v857_v3 = vld [vmem:[%s1077_s1 + $0x48] sm:$0xff] (!%p217_p3)   ;;  %p271_p6 = scmp.lt.s32.totalorder (!%p217_p3), %s901_s15, 1  ;;  %v859_v5 = vld [vmem:[%s1077_s1 + $0x50] sm:$0xff] (!%p217_p3)  }
   0x9   : > { %s1090_s21 = smov (%p35_p4, %s1088_s21), 0  ;;  %220 = sbr.rel (%p217_p3) target bundleno = 266 (0x10a), region = 36 }
   0xa   : > { %v856_v1 = vld [vmem:[%s1077_s1] sm:$0xff] (!%p217_p3)   ;;  %798 = vmatprep.subr.bf16.mxu1 (!%p217_p3), %v919_v2  ;;  %771 = vmatprep.subr.bf16.mxu0 (!%p217_p3), %v855_v0  ;;  %v858_v4 = vld [vmem:[%s1077_s1 + $0x8] sm:$0xff] (!%p217_p3)   ;;  %v860_v6 = vld [vmem:[%s1077_s1 + $0x10] sm:$0xff] (!%p217_p3)   ;;  %vm920_vm0 = vmmov (!%p217_p3), 0   ;;  %s921_s5 = smov (!%p217_p3), 64   ;;  %vm494_vm1 = vcmask (!%p217_p3), 523264  }
   0xb   : > { %772 = vmatpush3.bf16.msra.mxu0 (!%p217_p3), %v856_v1  ;;  %v861_v7 = vld [vmem:[%s1077_s1 + $0x58] sm:$0xff] (!%p217_p3)   ;;  %806 = vmatprep.mubr.msk.bf16.mxu1 (!%p217_p3), %vm920_vm0, %v919_v2  ;;  %v865_v8 = vld [vmem:[%s1077_s1 + $0x80] sm:$0xff] (!%p217_p3)   ;;  %v868_v11 = vld [vmem:[%s1077_s1 + $0x88] sm:$0xff] (!%p217_p3)  }
   0xc   : > { %773 = vmatprep.subr.bf16.mxu0 (!%p217_p3), %v857_v3  ;;  %v862_v9 = vld [vmem:[%s1077_s1 + $0x18] sm:$0xff] (!%p217_p3)   ;;  %v863_v10 = vld [vmem:[%s1077_s1 + $0x60] sm:$0xff] (!%p217_p3)   ;;  %799 = vmatpush3.bf16.msra.mxu1 (!%p217_p3), %v865_v8  ;;  %v866_v13 = vld [vmem:[%s1077_s1 + $0x68] sm:$0xff] (!%p217_p3)  }
   0xd   : > { %800 = vmatprep.subr.bf16.mxu1 (!%p217_p3), %v919_v2  ;;  %v864_v12 = vld [vmem:[%s1077_s1 + $0x20] sm:$0xff] (!%p217_p3)   ;;  %v871_v14 = vld [vmem:[%s1077_s1 + $0x90] sm:$0xff] (!%p217_p3)   ;;  %v867_v15 = vld [vmem:[%s1077_s1 + $0x28] sm:$0xff] (!%p217_p3)  }
   0xe   : > { %v869_v16 = vld [vmem:[%s1077_s1 + $0x70] sm:$0xff] (!%p217_p3)   ;;  %v877_v18 = vld [vmem:[%s1077_s1 + $0x98] sm:$0xff] (!%p217_p3)   ;;  %v743_v33 = vld [vmem:[%s1078_s2] ss:$0 sm:$0xff] (!%p217_p3) }
   0xf   : > { %774 = vmatpush3.bf16.msra.mxu0 (!%p217_p3), %v858_v4  ;;  %v870_v20 = vld [vmem:[%s1077_s1 + $0x30] sm:$0xff] (!%p217_p3)   ;;  %v872_v22 = vld [vmem:[%s1077_s1 + $0x78] sm:$0xff] (!%p217_p3)  }
  0x10   : > { %s1092_s16 = smov (!%p269_p5, %s905_s16), 1  ;;  %s1094_s15 = smov (!%p271_p6, %s901_s15), 1  ;;  %775 = vmatprep.subr.bf16.mxu0 %v859_v5  ;;  %801 = vmatpush3.bf16.msra.mxu1 %v868_v11  ;;  %v873_v24 = vld [vmem:[%s1077_s1 + $0x38] sm:$0xff]  }
  0x11   : > { %s811_s8 = smul.u32 12, %s1092_s16  ;;  %802 = vmatprep.subr.bf16.mxu1 %v919_v2  ;;  %s740_s10 = sshll.u32 %s1094_s15, 1 }
  0x12   : > { %s810_s9 = smul.u32 6, %s1094_s15  ;;  %s741_s11 = sshll.u32 %s1092_s16, 2 }
  0x13   : > { %776 = vmatpush3.bf16.msra.mxu0 %v860_v6  ;;  %s303_s22 = sadd.s32 %s741_s11, %s740_s10 }
  0x14   : > { %s279_s23 = sadd.s32 %s811_s8, %s810_s9  ;;  %777 = vmatprep.subr.bf16.mxu0 %v861_v7  ;;  %s770_s9 = sshll.u32 %s1092_s16, 4  ;;  %803 = vmatpush3.bf16.msra.mxu1 %v871_v14 }
  0x15   : > { %s737_s30 = sshll.u32 %s279_s23, 2  ;;  %s291_s26 = scalar_lea.vmem %s1079_s3, %s770_s9  ;;  %804 = vmatprep.subr.bf16.mxu1 %v919_v2 }
  0x16   : > { %s281_s12 = scalar_lea.vmem %s1076_s0, %s737_s30  ;;  %v580_v19 = vld [vmem:[%s291_s26] sm:$0xff]  ;;  %v581_v23 = vld [vmem:[%s291_s26 + $0x8] sm:$0xff] }
  0x17   : > { %778 = vmatpush3.bf16.msra.mxu0 %v862_v9  ;;  %v876_v17 = vld [vmem:[%s281_s12 + $0x4] ss:$12 sps:$4 sm:$0xff]   ;;  %v878_v21 = vld [vmem:[%s281_s12 + $0x8] ss:$12 sps:$4 sm:$0xff]   ;;  %584 = vrot.lane.b32.xlu0 %v580_v19, %s921_s5  ;;  %v874_v25 = vld [vmem:[%s281_s12] ss:$12 sps:$4 sm:$0xff]  }
  0x18   : > { %779 = vmatprep.subr.bf16.mxu0 %v863_v10  ;;  %530 = vmatprep.mubr.bf16.mxu0 %v876_v17  ;;  %s742_s12 = sshll.u32 %s303_s22, 3 }
  0x19   : > { %805 = vmatpush3.bf16.msra.mxu1 %v877_v18  ;;  %s305_s16 = scalar_lea.vmem %s1080_s4, %s742_s12 }
  0x1b   : > { %780 = vmatpush3.bf16.msra.mxu0 %v864_v12  ;;  %586 = vrot.lane.b32.xlu0 %v581_v23, %s921_s5 }
  0x1c   : > { %781 = vmatprep.subr.bf16.mxu0 %v866_v13  ;;  %807 = vmatmul.mubr.msk.bf16.vlgmr.msra.gmra.mrb[0].mxu1 %vm494_vm1, %v878_v21 }
  0x1f   : > { %782 = vmatpush3.bf16.msra.mxu0 %v867_v15 }
  0x20   : > { %783 = vmatprep.subr.bf16.mxu0 %v869_v16 }
  0x23   : > { %784 = vmatpush3.bf16.msra.mxu0 %v870_v20 }
  0x24   : > { %785 = vmatprep.subr.bf16.mxu0 %v872_v22 }
  0x27   : > { %786 = vmatpush3.bf16.msra.mxu0 %v873_v24 }
  0x2a   : > { %531 = vmatmul.mubr.bf16.vlgmr.msra.gmra.mrb[0].mxu0 %v874_v25 }
  0x89   : > { %v585_v30 = vpop.permute.xlu0 %584 }
  0x8a   : > { %v590_v42 = vsel %vm494_vm1, %v580_v19, %v585_v30 }
  0x8d   : > { %v587_v39 = vpop.permute.xlu0 %586 }
  0x8e   : > { %v591_v43 = vsel %vm494_vm1, %v581_v23, %v587_v39 }
  0xef   : > { %v573_v26 = vpop.f32.mrb[0].mxu1 }
  0xf0   : > { %v808_v27 = vpop.f32.mrb[1].mxu1 }
  0xf1   : > { %v576_v28 = vpop.f32.mrb[2].mxu1 }
  0xf2   : > { %v809_v29 = vpop.f32.mrb[3].mxu1 }
  0xfd   : > { %v787_v31 = vpop.f32.mrb[0].mxu0 }
  0xfe   : > { %v788_v32 = vpop.f32.mrb[1].mxu0 }
  0xff   : > { %v789_v34 = vadd.f32 %v788_v32, %v787_v31  ;;  %v790_v35 = vpop.f32.mrb[2].mxu0 }
 0x100   : > { %v791_v36 = vpop.f32.mrb[3].mxu0 }
 0x101   : > { %v533_v37 = vadd.f32 %v789_v34, %v743_v33  ;;  %v792_v38 = vadd.f32 %v791_v36, %v790_v35 }
 0x103   : > { %v574_v40 = vadd.f32 %v573_v26, %v533_v37  ;;  %v536_v41 = vadd.f32 %v792_v38, %v743_v33 }
 0x105   : > { %v592_v44 = vadd.f32 %v590_v42, %v574_v40  ;;  %v577_v45 = vadd.f32 %v576_v28, %v536_v41 }
 0x107   : > { %594 = vst [vmem:[%s305_s16] sm:$0xff] %v592_v44  ;;  %v593_v46 = vadd.f32 %v591_v43, %v577_v45 }
 0x109   : > { %595 = vst [vmem:[%s305_s16 + $0x8] sm:$0xff] %v593_v46 }
 0x10a PF: > { %s14_s19 = sadd.s32 1, %s917_s19   ;;  %s1081_s15 = smov %s909_s17 }
 0x10b   : > { %p11_p7 = scmp.ge.s32.totalorder %s14_s19, 6   ;;  %s1082_s16 = smov %s913_s18 }
 0x10c   : > { %s1083_s17 = smov %s1086_s20  ;;  %s1084_s18 = smov %s1090_s21 }
 0x10d   :  { %13 = sbr.rel (!%p11_p7) target bundleno = 3 (0x3), region = 69 }

// kernel: forward.9
= control target key start
LH: loop header
LB: loop body
LE: loop exit
PB: predicated region body
PF: predicated region fallthrough
CT: control target
= control target key end

     0   :  { %s894_s15 = smov 0   ;;  %s896_s16 = smov 0   ;;  %s1005_s0 = inlined_call_operand.vmem [shape: bf16[2,2,2,32,128], index: 0, kind: input, shape index: {}]   ;;  %s1006_s1 = inlined_call_operand.vmem [shape: bf16[128,128], index: 1, kind: input, shape index: {}]   ;;  %s1007_s2 = inlined_call_operand.vmem [shape: f32[1,128], index: 2, kind: input, shape index: {}]   ;;  %s1008_s3 = inlined_call_operand.vmem [shape: f32[2,2,32,64], index: 3, kind: input, shape index: {}]   ;;  %s1009_s4 = inlined_call_operand.vmem [shape: f32[2,2,2,32,128], index: 4, kind: output, shape index: {}]  }
   0x1   :  { %s898_s17 = smov 0   ;;  %s900_s18 = smov 0  }
   0x2   :  { %s902_s19 = smov 0   ;;  %s904_s20 = smov 0  }
   0x3   :  { %s906_s21 = smov 0  }
   0x4 LB: > { %s32_s22 = sadd.s32 1, %s854_s18  ;;  %s36_s23 = sadd.s32 1, %s858_s19  ;;  %s866_s21 = sphi %s906_s21, %s14_s21   ;;  %s862_s20 = sphi %s904_s20, %s1015_s20   ;;  %s858_s19 = sphi %s902_s19, %s1014_s19   ;;  %s854_s18 = sphi %s900_s18, %s1013_s18   ;;  %s850_s17 = sphi %s898_s17, %s1012_s17   ;;  %s846_s16 = sphi %s896_s16, %s1011_s16   ;;  %s842_s15 = sphi %s894_s15, %s1010_s15  }
   0x5   : > { %p34_p0 = scmp.ge.s32.totalorder %s32_s22, 2  ;;  %p690_p1 = scmp.ge.s32.totalorder %s866_s21, 1 }
   0x6   : > { %p236_p2 = scmp.lt.s32.totalorder %s866_s21, 9  ;;  %s40_s24 = sadd.s32 1, %s862_s20 }
   0x7   : > { %s1017_s22 = smov (%p34_p0, %s32_s22), 0  ;;  %s1019_s23 = smov (!%p34_p0, %s36_s23), %s858_s19 }
   0x8   : > { %p237_p3 = pnand %p690_p1, %p236_p2  ;;  %p38_p4 = scmp.ge.s32.totalorder %s1019_s23, 2 }
   0x9   : > { %v802_v0 = vld [vmem:[%s1006_s1] sm:$0xff] (!%p237_p3)   ;;  %p300_p6 = scmp.lt.s32.totalorder (!%p237_p3), %s850_s17, 1  ;;  %v803_v1 = vld [vmem:[%s1006_s1 + $0x8] sm:$0xff] (!%p237_p3)   ;;  %p302_p7 = scmp.lt.s32.totalorder (!%p237_p3), %s846_s16, 1  ;;  %v804_v2 = vld [vmem:[%s1006_s1 + $0x10] sm:$0xff] (!%p237_p3)   ;;  %vm506_vm0 = vcmask (!%p237_p3), 523264  }
   0xa   : > { %s1021_s23 = smov (%p38_p4, %s1019_s23), 0  ;;  %s1023_s24 = smov (!%p38_p4, %s40_s24), %s862_s20 }
   0xb   : > { %p42_p5 = scmp.ge.s32.totalorder %s1023_s24, 2  ;;  %240 = sbr.rel (%p237_p3) target bundleno = 263 (0x107), region = 36  ;;  %725 = vmatprep.subr.bf16.mxu0 (!%p237_p3), %v802_v0  ;;  %v805_v3 = vld [vmem:[%s1006_s1 + $0x18] sm:$0xff] (!%p237_p3)   ;;  %v806_v4 = vld [vmem:[%s1006_s1 + $0x20] sm:$0xff] (!%p237_p3)   ;;  %v807_v8 = vld [vmem:[%s1006_s1 + $0x28] sm:$0xff] (!%p237_p3)  }
   0xc   : > { %726 = vmatpush3.bf16.msra.mxu0 (!%p237_p3), %v802_v0  ;;  %p304_p8 = scmp.lt.s32.totalorder (!%p237_p3), %s842_s15, 1  ;;  %s868_s7 = smov (!%p237_p3), 64   ;;  %v808_v11 = vld [vmem:[%s1006_s1 + $0x30] sm:$0xff] (!%p237_p3)   ;;  %v809_v12 = vld [vmem:[%s1006_s1 + $0x38] sm:$0xff] (!%p237_p3)   ;;  %v702_v16 = vld [vmem:[%s1007_s2] ss:$0 sm:$0xff] (!%p237_p3) }
   0xd   : > { %s1025_s24 = smov (%p42_p5, %s1023_s24), 0  ;;  %727 = vmatprep.subr.bf16.mxu0 (!%p237_p3), %v803_v1 }
  0x10   : > { %728 = vmatpush3.bf16.msra.mxu0 (!%p237_p3), %v803_v1 }
  0x11   : > { %729 = vmatprep.subr.bf16.mxu0 (!%p237_p3), %v804_v2 }
  0x12   : > { %s1027_s17 = smov (!%p300_p6, %s850_s17), 1  ;;  %s1029_s16 = smov (!%p302_p7, %s846_s16), 1 }
  0x13   : > { %s692_s5 = sshll.u32 %s1029_s16, 3  ;;  %s1031_s15 = smov (!%p304_p8, %s842_s15), 1 }
  0x14   : > { %s693_s6 = sshll.u32 %s1027_s17, 4  ;;  %s691_s9 = sshll.u32 %s1031_s15, 2  ;;  %730 = vmatpush3.bf16.msra.mxu0 %v804_v2 }
  0x15   : > { %s696_s10 = sshll.u32 %s1027_s17, 3  ;;  %s311_s11 = sadd.s32 %s692_s5, %s691_s9  ;;  %731 = vmatprep.subr.bf16.mxu0 %v805_v3 }
  0x16   : > { %s327_s12 = sadd.s32 %s696_s10, %s691_s9  ;;  %s952_s13 = sadd.s32 %s693_s6, %s311_s11 }
  0x17   : > { %s697_s14 = sshll.u32 %s327_s12, 3  ;;  %s694_s25 = sshll.u32 %s952_s13, 2 }
  0x18   : > { %s315_s29 = scalar_lea.vmem %s1005_s0, %s694_s25  ;;  %s329_s30 = scalar_lea.vmem %s1008_s3, %s697_s14  ;;  %732 = vmatpush3.bf16.msra.mxu0 %v805_v3 }
  0x19   : > { %v810_v5 = vld [vmem:[%s315_s29] sm:$0xff]   ;;  %v488_v6 = vld [vmem:[%s329_s30 + $0x10] sm:$0xff]  ;;  %733 = vmatprep.subr.bf16.mxu0 %v806_v4  ;;  %v489_v9 = vld [vmem:[%s329_s30 + $0x18] sm:$0xff]  ;;  %s701_s25 = sshll.u32 %s952_s13, 3 }
  0x1a   : > { %741 = vmatprep.mubr.bf16.mxu0 %v810_v5  ;;  %v486_v7 = vld [vmem:[%s329_s30] sm:$0xff]  ;;  %498 = vrot.lane.b32.xlu1 %v488_v6, %s868_s7  ;;  %v487_v10 = vld [vmem:[%s329_s30 + $0x8] sm:$0xff]  ;;  %s347_s27 = scalar_lea.vmem %s1009_s4, %s701_s25 }
  0x1b   : > { %494 = vrot.lane.b32.xlu0 %v486_v7, %s868_s7  ;;  %v811_v13 = vld [vmem:[%s315_s29 + $0x8] sm:$0xff]  }
  0x1c   : > { %734 = vmatpush3.bf16.msra.mxu0 %v806_v4 }
  0x1d   : > { %735 = vmatprep.subr.bf16.mxu0 %v807_v8 }
  0x1e   : > { %500 = vrot.lane.b32.xlu1 %v489_v9, %s868_s7 }
  0x1f   : > { %496 = vrot.lane.b32.xlu0 %v487_v10, %s868_s7 }
  0x20   : > { %736 = vmatpush3.bf16.msra.mxu0 %v807_v8 }
  0x21   : > { %737 = vmatprep.subr.bf16.mxu0 %v808_v11 }
  0x24   : > { %738 = vmatpush3.bf16.msra.mxu0 %v808_v11 }
  0x25   : > { %739 = vmatprep.subr.bf16.mxu0 %v809_v12 }
  0x28   : > { %740 = vmatpush3.bf16.msra.mxu0 %v809_v12 }
  0x2b   : > { %742 = vmatmul.mubr.bf16.vlgmr.msra.gmra.mrb[0].mxu0 %v811_v13 }
  0x8c   : > { %v499_v14 = vpop.permute.xlu1 %498 }
  0x8d   : > { %v495_v15 = vpop.permute.xlu0 %494  ;;  %v509_v18 = vsel %vm506_vm0, %v488_v6, %v499_v14 }
  0x8e   : > { %v507_v26 = vsel %vm506_vm0, %v486_v7, %v495_v15 }
  0x90   : > { %v501_v17 = vpop.permute.xlu1 %500 }
  0x91   : > { %v497_v20 = vpop.permute.xlu0 %496  ;;  %v510_v25 = vsel %vm506_vm0, %v489_v9, %v501_v17 }
  0x92   : > { %v508_v30 = vsel %vm506_vm0, %v487_v10, %v497_v20 }
  0xfe   : > { %v743_v19 = vpop.f32.mrb[0].mxu0 }
  0xff   : > { %v480_v21 = vadd.f32 %v743_v19, %v702_v16  ;;  %v471_v22 = vpop.f32.mrb[1].mxu0 }
 0x100   : > { %v472_v23 = vadd.f32 %v702_v16, %v471_v22  ;;  %v744_v24 = vpop.f32.mrb[2].mxu0 }
 0x101   : > { %v513_v27 = vadd.f32 %v509_v18, %v480_v21  ;;  %v483_v28 = vadd.f32 %v744_v24, %v702_v16  ;;  %v474_v29 = vpop.f32.mrb[3].mxu0 }
 0x102   : > { %v511_v31 = vadd.f32 %v507_v26, %v472_v23  ;;  %v475_v32 = vadd.f32 %v702_v16, %v474_v29 }
 0x103   : > { %517 = vst [vmem:[%s347_s27 + $0x10] sm:$0xff] %v513_v27  ;;  %v514_v33 = vadd.f32 %v510_v25, %v483_v28 }
 0x104   : > { %515 = vst [vmem:[%s347_s27] sm:$0xff] %v511_v31  ;;  %v512_v34 = vadd.f32 %v508_v30, %v475_v32 }
 0x105   : > { %518 = vst [vmem:[%s347_s27 + $0x18] sm:$0xff] %v514_v33 }
 0x106   : > { %516 = vst [vmem:[%s347_s27 + $0x8] sm:$0xff] %v512_v34 }
 0x107 PF: > { %s14_s21 = sadd.s32 1, %s866_s21   ;;  %s1010_s15 = smov %s854_s18 }
 0x108   : > { %p11_p9 = scmp.ge.s32.totalorder %s14_s21, 10   ;;  %s1011_s16 = smov %s858_s19 }
 0x109   : > { %s1012_s17 = smov %s862_s20  ;;  %s1013_s18 = smov %s1017_s22 }
 0x10a   : > { %s1014_s19 = smov %s1021_s23  ;;  %s1015_s20 = smov %s1025_s24 }
 0x10b   :  { %13 = sbr.rel (!%p11_p9) target bundleno = 4 (0x4), region = 69 }

</bundles_post_ra>
